<compile_context>
chip_gen: v6e
topology: v6e:2x2x1
jax: 0.10.0
libtpu: 0.0.40
codegen_flags: <defaults>
</compile_context>

<pallas_src>
import functools

import jax
import jax.numpy as jnp
from jax.experimental import pallas as pl
from jax.experimental.pallas import tpu as pltpu


def _round_up(x, m):
    return ((x + m - 1) // m) * m


def _temporal_block_kernel(
    x_prev_ref,   # (halo_tl, Cp_in)   halo block just before the current tile
    x_cur_ref,    # (tl, Cp_in)        current L-tile
    x_next_ref,   # (halo_tl, Cp_in)   halo block just after the current tile
    w1_ref,       # (K, Cp_in, Cp_out) conv1 weights, one (Cin,Cout) slice per tap
    b1_ref,       # (1, Cp_out)        f32
    w2_ref,       # (K, Cp_out, Cp_out)
    b2_ref,       # (1, Cp_out)        f32
    *rest,        # [wd_ref (Cp_in,Cp_out), bd_ref (1,Cp_out)] if downsample, then out_ref
    K, dilation, pad, L, tile_l, halo_tl, use_downsample,
):
    if use_downsample:
        wd_ref, bd_ref, out_ref = rest
    else:
        (out_ref,) = rest

    lt = pl.program_id(1)
    d = dilation
    tl = tile_l
    lh = tl + 2 * pad          # h rows needed to produce tl outputs
    slab_len = tl + 4 * pad    # x rows needed to produce those h rows

    # ---- assemble x slab covering positions [lt*tl - 2*pad, lt*tl + tl + 2*pad) ----
    # Single small splice (2*pad rows on each side of the tile); the K-wide tap
    # concatenations of the previous version are gone.
    if pad > 0:
        x_slab = jnp.concatenate(
            [x_prev_ref[halo_tl - 2 * pad:, :],
             x_cur_ref[...],
             x_next_ref[:2 * pad, :]],
            axis=0)
    else:
        x_slab = x_cur_ref[...]

    # Zero rows outside the true sequence [0, L): implements conv1's zero padding and
    # masks garbage from clamped / partial boundary blocks.
    base = lt * tl - 2 * pad
    pos_x = base + jax.lax.broadcasted_iota(jnp.int32, (slab_len, 1), 0)
    x_slab = jnp.where((pos_x >= 0) & (pos_x < L), x_slab, 0)

    # ---- conv1 (dilated): K accumulating MXU matmuls + bias + ReLU ----
    acc1 = jnp.dot(x_slab[0:lh, :], w1_ref[0], preferred_element_type=jnp.float32)
    for k in range(1, K):
        acc1 = acc1 + jnp.dot(x_slab[k * d:k * d + lh, :], w1_ref[k],
                              preferred_element_type=jnp.float32)
    h = jnp.maximum(acc1 + b1_ref[...], 0.0)

    # conv2's zero padding: h only exists on [0, L)
    pos_h = (lt * tl - pad) + jax.lax.broadcasted_iota(jnp.int32, (lh, 1), 0)
    h = jnp.where((pos_h >= 0) & (pos_h < L), h, 0.0)
    h = h.astype(x_cur_ref.dtype)

    # ---- conv2 (dilated): K accumulating MXU matmuls + bias + ReLU ----
    acc2 = jnp.dot(h[0:tl, :], w2_ref[0], preferred_element_type=jnp.float32)
    for k in range(1, K):
        acc2 = acc2 + jnp.dot(h[k * d:k * d + tl, :], w2_ref[k],
                              preferred_element_type=jnp.float32)
    out2 = jnp.maximum(acc2 + b2_ref[...], 0.0)

    # ---- residual path + final ReLU ----
    x_mid = x_slab[2 * pad:2 * pad + tl, :]     # original positions of this tile
    if use_downsample:
        res = jnp.dot(x_mid, wd_ref[...], preferred_element_type=jnp.float32) + bd_ref[...]
    else:
        res = x_mid.astype(jnp.float32)

    out_ref[...] = jnp.maximum(out2 + res, 0.0).astype(out_ref.dtype)


def prepare_temporal_block_params(params, *, kernel_size, compute_dtype=jnp.float32,
                                  lane_multiple=128, pad_channels=True):
    """One-time weight re-layout: (Cout,Cin,K) -> (K, Cp_in, Cp_out), channels padded
    to lane multiples, cast to the compute dtype.  Hoisted out of the forward call so
    a deep TCN stack does this once per layer, not once per step."""
    w1 = jnp.asarray(params["w1"])                  # (Cout, Cin, K)
    w2 = jnp.asarray(params["w2"])                  # (Cout, Cout, K)
    Cout, Cin, K = w1.shape
    assert K == kernel_size
    cp_in = _round_up(Cin, lane_multiple) if pad_channels else Cin
    cp_out = _round_up(Cout, lane_multiple) if pad_channels else Cout

    def pad_w(w_kio, rows, cols):                    # (K, r0, c0) -> (K, rows, cols)
        return jnp.pad(w_kio, ((0, 0), (0, rows - w_kio.shape[1]), (0, cols - w_kio.shape[2])))

    def pad_b(b):
        return jnp.pad(jnp.asarray(b), (0, cp_out - Cout)).reshape(1, cp_out).astype(jnp.float32)

    w1p = pad_w(jnp.transpose(w1, (2, 1, 0)), cp_in, cp_out).astype(compute_dtype)
    w2p = pad_w(jnp.transpose(w2, (2, 1, 0)), cp_out, cp_out).astype(compute_dtype)
    b1p, b2p = pad_b(params["b1"]), pad_b(params["b2"])

    use_downsample = params.get("wd") is not None
    if use_downsample:
        wdp = jnp.pad(jnp.transpose(jnp.asarray(params["wd"])[:, :, 0], (1, 0)),
                      ((0, cp_in - Cin), (0, cp_out - Cout))).astype(compute_dtype)
        bdp = pad_b(params["bd"])
    else:
        assert Cin == Cout, "identity residual requires n_inputs == n_outputs"
        wdp, bdp = None, None

    return dict(w1=w1p, b1=b1p, w2=w2p, b2=b2p, wd=wdp, bd=bdp,
                kernel_size=K, c_in=Cin, c_out=Cout, cp_in=cp_in, cp_out=cp_out,
                compute_dtype=compute_dtype, use_downsample=use_downsample)


def temporal_block_forward_nlc(x_nlc, prep, *, kernel_size, stride, dilation, padding,
                               tile_l=512):
    """Channels-last entry point. x_nlc: (N, L, C_in). Returns (N, L, C_out).

    For a stacked TCN, keep activations channel-padded (Cp) end-to-end so the
    channel pad/slice at this boundary is a no-op, and call this NLC entry point
    directly so the NCL<->NLC transpose happens once per network."""
    assert stride == 1, "TemporalBlock kernel supports stride=1 (same-length conv)"
    K = kernel_size
    assert prep["kernel_size"] == K
    d, pad = dilation, padding
    assert 2 * pad == d * (K - 1), (
        "kernel assumes the same-length config: padding == (kernel_size-1)//2 * dilation "
        "with odd kernel_size")

    N, L, Cin = x_nlc.shape
    assert Cin == prep["c_in"]
    Cout, cp_in, cp_out = prep["c_out"], prep["cp_in"], prep["cp_out"]
    use_ds = prep["use_downsample"]
    cdt = prep["compute_dtype"]

    x = x_nlc.astype(cdt)
    if cp_in != Cin:
        x = jnp.pad(x, ((0, 0), (0, 0), (0, cp_in - Cin)))   # no-op at production shapes

    # --- tile sizes: multiples of 8 sublanes; halo holds 2*pad rows; tl a multiple of halo ---
    halo_tl = _round_up(max(2 * pad, 8), 8)
    tl = _round_up(min(max(tile_l, halo_tl), _round_up(L, halo_tl)), halo_tl)

    x_item = jnp.dtype(cdt).itemsize

    def vmem_bytes(t):
        act = 2 * ((t + 2 * halo_tl) * cp_in + t * cp_out) * x_item          # dbl-buffered blocks
        wts = 2 * (K * cp_in * cp_out + K * cp_out * cp_out
                   + (cp_in * cp_out if use_ds else 0)) * x_item + 6 * cp_out * 4
        tmp = ((t + 4 * pad) * cp_in * x_item                                # slab
               + 2 * (t + 2 * pad) * cp_out * 4 + 2 * t * cp_out * 4)        # f32 acc/h/out2
        return act + wts + tmp

    budget = 20 * 1024 * 1024   # conservative: headroom under v7x's 64 MiB physical VMEM
    while tl > halo_tl and vmem_bytes(tl) > budget:
        tl = max(halo_tl, _round_up(tl // 2, halo_tl))

    n_lt = -(-L // tl)
    r = tl // halo_tl
    n_halo = -(-L // halo_tl)

    kernel = functools.partial(
        _temporal_block_kernel,
        K=K, dilation=d, pad=pad, L=L, tile_l=tl, halo_tl=halo_tl,
        use_downsample=use_ds,
    )

    in_specs = [
        # prev halo: rows [i*tl - halo_tl, i*tl), clamped at the left edge (masked in-kernel)
        pl.BlockSpec((None, halo_tl, cp_in),
                     lambda n, i: (n, jnp.maximum(i * r - 1, 0), 0)),
        # current tile: rows [i*tl, i*tl + tl)
        pl.BlockSpec((None, tl, cp_in), lambda n, i: (n, i, 0)),
        # next halo: rows [(i+1)*tl, (i+1)*tl + halo_tl), clamped at the right edge
        pl.BlockSpec((None, halo_tl, cp_in),
                     lambda n, i: (n, jnp.minimum((i + 1) * r, n_halo - 1), 0)),
        # weights / biases: constant index maps -> fetched once, VMEM-resident
        pl.BlockSpec((K, cp_in, cp_out), lambda n, i: (0, 0, 0)),
        pl.BlockSpec((1, cp_out), lambda n, i: (0, 0)),
        pl.BlockSpec((K, cp_out, cp_out), lambda n, i: (0, 0, 0)),
        pl.BlockSpec((1, cp_out), lambda n, i: (0, 0)),
    ]
    args = [x, x, x, prep["w1"], prep["b1"], prep["w2"], prep["b2"]]
    if use_ds:
        in_specs += [pl.BlockSpec((cp_in, cp_out), lambda n, i: (0, 0)),
                     pl.BlockSpec((1, cp_out), lambda n, i: (0, 0))]
        args += [prep["wd"], prep["bd"]]

    flops = 2 * N * L * K * cp_in * cp_out + 2 * N * L * K * cp_out * cp_out
    if use_ds:
        flops += 2 * N * L * cp_in * cp_out
    bytes_accessed = int(
        N * n_lt * (tl + 2 * halo_tl) * cp_in * x_item        # activation reads incl. halos
        + N * L * cp_out * x_item                             # output writes
        + sum(a.size * a.dtype.itemsize for a in args[3:])    # weights / biases
    )

    out = pl.pallas_call(
        kernel,
        out_shape=jax.ShapeDtypeStruct((N, L, cp_out), cdt),
        grid=(N, n_lt),
        in_specs=in_specs,
        out_specs=pl.BlockSpec((None, tl, cp_out), lambda n, i: (n, i, 0)),
        compiler_params=pltpu.CompilerParams(
            dimension_semantics=("parallel", "parallel"),
            vmem_limit_bytes=int(min(48 * 1024 * 1024,
                                     max(16 * 1024 * 1024, 2 * vmem_bytes(tl)))),
        ),
        cost_estimate=pl.CostEstimate(flops=int(flops), transcendentals=0,
                                      bytes_accessed=bytes_accessed),
    )(*args)

    if cp_out != Cout:
        out = out[:, :, :Cout]     # no-op when channels are lane multiples
    return out


def temporal_block_forward(x_ncl, prep, *, kernel_size, stride, dilation, padding,
                           tile_l=512):
    """PyTorch-layout wrapper. x_ncl: (N, C_in, L) -> (N, C_out, L)."""
    out_nlc = temporal_block_forward_nlc(
        jnp.transpose(x_ncl, (0, 2, 1)), prep,
        kernel_size=kernel_size, stride=stride, dilation=dilation, padding=padding,
        tile_l=tile_l)
    return jnp.transpose(out_nlc, (0, 2, 1))


def _make_params(key, n_inputs, n_outputs, kernel_size):
    """Init mirroring the module's init_weights (weights ~ N(0,0.01), PyTorch-uniform biases)."""
    ks = jax.random.split(key, 6)
    w1 = 0.01 * jax.random.normal(ks[0], (n_outputs, n_inputs, kernel_size), jnp.float32)
    w2 = 0.01 * jax.random.normal(ks[1], (n_outputs, n_outputs, kernel_size), jnp.float32)
    bnd1 = 1.0 / jnp.sqrt(n_inputs * kernel_size)
    bnd2 = 1.0 / jnp.sqrt(n_outputs * kernel_size)
    b1 = jax.random.uniform(ks[2], (n_outputs,), jnp.float32, -bnd1, bnd1)
    b2 = jax.random.uniform(ks[3], (n_outputs,), jnp.float32, -bnd2, bnd2)
    if n_inputs != n_outputs:
        wd = 0.01 * jax.random.normal(ks[4], (n_outputs, n_inputs, 1), jnp.float32)
        bndd = 1.0 / jnp.sqrt(n_inputs)
        bd = jax.random.uniform(ks[5], (n_outputs,), jnp.float32, -bndd, bndd)
    else:
        wd, bd = None, None
    return {"w1": w1, "b1": b1, "w2": w2, "b2": b2, "wd": wd, "bd": bd}


def _ref_forward(x_ncl, p, *, kernel_size, stride, dilation, padding):
    """Plain-JAX reference matching the PyTorch module (eval mode)."""
    def conv1d(x, w, b, dil, pd):
        y = jax.lax.conv_general_dilated(
            x, w, window_strides=(stride,), padding=[(pd, pd)],
            rhs_dilation=(dil,), dimension_numbers=("NCH", "OIH", "NCH"))
        return y + b[None, :, None]

    h = jnp.maximum(conv1d(x_ncl, p["w1"], p["b1"], dilation, padding), 0.0)
    o = jnp.maximum(conv1d(h, p["w2"], p["b2"], dilation, padding), 0.0)
    res = x_ncl if p["wd"] is None else conv1d(x_ncl, p["wd"], p["bd"], 1, 0)
    return jnp.maximum(o + res, 0.0)


if __name__ == "__main__":
    key = jax.random.PRNGKey(0)
    configs = [
        # downsample residual path, dilation 2
        dict(n_inputs=4, n_outputs=8, kernel_size=3, dilation=2, N=2, L=24),
        # identity residual path, dilation 1, ragged last tile (L=24, tile=16)
        dict(n_inputs=8, n_outputs=8, kernel_size=3, dilation=1, N=2, L=24),
    ]
    for cfg in configs:
        K, dil = cfg["kernel_size"], cfg["dilation"]
        pad = (K - 1) // 2 * dil
        kx, kp, key = jax.random.split(key, 3)
        x = jax.random.normal(kx, (cfg["N"], cfg["n_inputs"], cfg["L"]), jnp.float32)
        params = _make_params(kp, cfg["n_inputs"], cfg["n_outputs"], K)
        prep = prepare_temporal_block_params(params, kernel_size=K,
                                             compute_dtype=jnp.float32)

        out = temporal_block_forward(x, prep, kernel_size=K, stride=1, dilation=dil,
                                     padding=pad, tile_l=16)
        out = jax.block_until_ready(out)

        ref = _ref_forward(x, params, kernel_size=K, stride=1, dilation=dil, padding=pad)
        assert out.shape == (cfg["N"], cfg["n_outputs"], cfg["L"])
        assert jnp.allclose(out, ref, atol=1e-5, rtol=1e-5), "mismatch vs JAX reference"

    print("KERNEL_OK")
</pallas_src>

<mosaic_0001>
module attributes {stable_mosaic.version = 11 : i64} {
  func.func @_temporal_block_kernel(%arg0: i32, %arg1: i32, %arg2: memref<1x8x128xf32, #tpu.memory_space<vmem>>, %arg3: memref<1x16x128xf32, #tpu.memory_space<vmem>>, %arg4: memref<1x8x128xf32, #tpu.memory_space<vmem>>, %arg5: memref<3x128x128xf32, #tpu.memory_space<vmem>>, %arg6: memref<1x128xf32, #tpu.memory_space<vmem>>, %arg7: memref<3x128x128xf32, #tpu.memory_space<vmem>>, %arg8: memref<1x128xf32, #tpu.memory_space<vmem>>, %arg9: memref<128x128xf32, #tpu.memory_space<vmem>>, %arg10: memref<1x128xf32, #tpu.memory_space<vmem>>, %arg11: memref<1x16x128xf32, #tpu.memory_space<vmem>>) attributes {dimension_semantics = [#tpu.dimension_semantics<parallel>, #tpu.dimension_semantics<parallel>], iteration_bounds = array<i64: 2, 2>, scalar_prefetch = 0 : i64, scratch_operands = 0 : i64, tpu.core_type = #tpu.core_type<tc>, window_params = [{transform_indices = @transform_0, window_bounds = array<i64: 1, 8, 128>}, {transform_indices = @transform_1, window_bounds = array<i64: 1, 16, 128>}, {transform_indices = @transform_2, window_bounds = array<i64: 1, 8, 128>}, {pipeline_mode = #tpu.pipeline_mode<synchronous>, transform_indices = @transform_3, window_bounds = array<i64: 3, 128, 128>}, {pipeline_mode = #tpu.pipeline_mode<synchronous>, transform_indices = @transform_4, window_bounds = array<i64: 1, 128>}, {pipeline_mode = #tpu.pipeline_mode<synchronous>, transform_indices = @transform_5, window_bounds = array<i64: 3, 128, 128>}, {pipeline_mode = #tpu.pipeline_mode<synchronous>, transform_indices = @transform_6, window_bounds = array<i64: 1, 128>}, {pipeline_mode = #tpu.pipeline_mode<synchronous>, transform_indices = @transform_7, window_bounds = array<i64: 128, 128>}, {pipeline_mode = #tpu.pipeline_mode<synchronous>, transform_indices = @transform_8, window_bounds = array<i64: 1, 128>}, {transform_indices = @transform_9, window_bounds = array<i64: 1, 16, 128>}]} {
    %c0 = arith.constant 0 : index
    %c4 = arith.constant 4 : index
    %c0_0 = arith.constant 0 : index
    %0 = vector.load %arg2[%c0, %c4, %c0_0] : memref<1x8x128xf32, #tpu.memory_space<vmem>>, vector<1x4x128xf32>
    %1 = vector.shape_cast %0 : vector<1x4x128xf32> to vector<4x128xf32>
    %c0_1 = arith.constant 0 : index
    %c0_2 = arith.constant 0 : index
    %c0_3 = arith.constant 0 : index
    %2 = vector.load %arg3[%c0_1, %c0_2, %c0_3] : memref<1x16x128xf32, #tpu.memory_space<vmem>>, vector<1x16x128xf32>
    %3 = vector.shape_cast %2 : vector<1x16x128xf32> to vector<16x128xf32>
    %c0_4 = arith.constant 0 : index
    %c0_5 = arith.constant 0 : index
    %c0_6 = arith.constant 0 : index
    %4 = vector.load %arg4[%c0_4, %c0_5, %c0_6] : memref<1x8x128xf32, #tpu.memory_space<vmem>>, vector<1x4x128xf32>
    %5 = vector.shape_cast %4 : vector<1x4x128xf32> to vector<4x128xf32>
    %6 = tpu.concatenate %1, %3, %5 in 0 : vector<4x128xf32>, vector<16x128xf32>, vector<4x128xf32> -> vector<24x128xf32>
    %c16_i32 = arith.constant 16 : i32
    %7 = arith.muli %arg1, %c16_i32 : i32
    %c4_i32 = arith.constant 4 : i32
    %8 = arith.subi %7, %c4_i32 : i32
    %9 = tpu.iota {dimensions = array<i32: 0>} : vector<24x1xi32>
    %10 = vector.broadcast %8 : i32 to vector<24x1xi32>
    %11 = arith.addi %10, %9 : vector<24x1xi32>
    %c0_i32 = arith.constant 0 : i32
    %12 = vector.broadcast %c0_i32 : i32 to vector<24x1xi32>
    %13 = arith.cmpi sge, %11, %12 : vector<24x1xi32>
    %c24_i32 = arith.constant 24 : i32
    %14 = vector.broadcast %c24_i32 : i32 to vector<24x1xi32>
    %15 = arith.cmpi slt, %11, %14 : vector<24x1xi32>
    %16 = arith.andi %13, %15 : vector<24x1xi1>
    %c0_i32_7 = arith.constant 0 : i32
    %17 = arith.sitofp %c0_i32_7 : i32 to f32
    %18 = vector.shape_cast %16 : vector<24x1xi1> to vector<24x1xi1>
    %19 = vector.broadcast %18 : vector<24x1xi1> to vector<24x128xi1>
    %20 = vector.broadcast %17 : f32 to vector<24x128xf32>
    %21 = arith.select %19, %6, %20 : vector<24x128xi1>, vector<24x128xf32>
    %22 = vector.extract_strided_slice %21 {offsets = [0, 0], sizes = [20, 128], strides = [1, 1]} : vector<24x128xf32> to vector<20x128xf32>
    %c0_8 = arith.constant 0 : index
    %c0_9 = arith.constant 0 : index
    %c0_10 = arith.constant 0 : index
    %23 = vector.load %arg5[%c0_8, %c0_9, %c0_10] : memref<3x128x128xf32, #tpu.memory_space<vmem>>, vector<1x128x128xf32>
    %24 = vector.shape_cast %23 : vector<1x128x128xf32> to vector<128x128xf32>
    %cst = arith.constant dense<0.000000e+00> : vector<20x128xf32>
    %25 = tpu.matmul %22, %24, %cst {dimension_numbers = #tpu.dot_dimension_numbers<[1], [0], [0], [1], [0, 0, 1, 1], [], []>} : vector<20x128xf32>, vector<128x128xf32>, vector<20x128xf32> -> vector<20x128xf32>
    %26 = vector.extract_strided_slice %21 {offsets = [2, 0], sizes = [20, 128], strides = [1, 1]} : vector<24x128xf32> to vector<20x128xf32>
    %c1 = arith.constant 1 : index
    %c0_11 = arith.constant 0 : index
    %c0_12 = arith.constant 0 : index
    %27 = vector.load %arg5[%c1, %c0_11, %c0_12] : memref<3x128x128xf32, #tpu.memory_space<vmem>>, vector<1x128x128xf32>
    %28 = vector.shape_cast %27 : vector<1x128x128xf32> to vector<128x128xf32>
    %cst_13 = arith.constant dense<0.000000e+00> : vector<20x128xf32>
    %29 = tpu.matmul %26, %28, %cst_13 {dimension_numbers = #tpu.dot_dimension_numbers<[1], [0], [0], [1], [0, 0, 1, 1], [], []>} : vector<20x128xf32>, vector<128x128xf32>, vector<20x128xf32> -> vector<20x128xf32>
    %30 = arith.addf %25, %29 : vector<20x128xf32>
    %31 = vector.extract_strided_slice %21 {offsets = [4, 0], sizes = [20, 128], strides = [1, 1]} : vector<24x128xf32> to vector<20x128xf32>
    %c2 = arith.constant 2 : index
    %c0_14 = arith.constant 0 : index
    %c0_15 = arith.constant 0 : index
    %32 = vector.load %arg5[%c2, %c0_14, %c0_15] : memref<3x128x128xf32, #tpu.memory_space<vmem>>, vector<1x128x128xf32>
    %33 = vector.shape_cast %32 : vector<1x128x128xf32> to vector<128x128xf32>
    %cst_16 = arith.constant dense<0.000000e+00> : vector<20x128xf32>
    %34 = tpu.matmul %31, %33, %cst_16 {dimension_numbers = #tpu.dot_dimension_numbers<[1], [0], [0], [1], [0, 0, 1, 1], [], []>} : vector<20x128xf32>, vector<128x128xf32>, vector<20x128xf32> -> vector<20x128xf32>
    %35 = arith.addf %30, %34 : vector<20x128xf32>
    %c0_17 = arith.constant 0 : index
    %c0_18 = arith.constant 0 : index
    %36 = vector.load %arg6[%c0_17, %c0_18] : memref<1x128xf32, #tpu.memory_space<vmem>>, vector<1x128xf32>
    %37 = vector.broadcast %36 : vector<1x128xf32> to vector<20x128xf32>
    %38 = arith.addf %35, %37 : vector<20x128xf32>
    %cst_19 = arith.constant 0.000000e+00 : f32
    %39 = vector.broadcast %cst_19 : f32 to vector<20x128xf32>
    %40 = arith.maximumf %38, %39 : vector<20x128xf32>
    %c16_i32_20 = arith.constant 16 : i32
    %41 = arith.muli %arg1, %c16_i32_20 : i32
    %c2_i32 = arith.constant 2 : i32
    %42 = arith.subi %41, %c2_i32 : i32
    %43 = tpu.iota {dimensions = array<i32: 0>} : vector<20x1xi32>
    %44 = vector.broadcast %42 : i32 to vector<20x1xi32>
    %45 = arith.addi %44, %43 : vector<20x1xi32>
    %c0_i32_21 = arith.constant 0 : i32
    %46 = vector.broadcast %c0_i32_21 : i32 to vector<20x1xi32>
    %47 = arith.cmpi sge, %45, %46 : vector<20x1xi32>
    %c24_i32_22 = arith.constant 24 : i32
    %48 = vector.broadcast %c24_i32_22 : i32 to vector<20x1xi32>
    %49 = arith.cmpi slt, %45, %48 : vector<20x1xi32>
    %50 = arith.andi %47, %49 : vector<20x1xi1>
    %cst_23 = arith.constant 0.000000e+00 : f32
    %51 = vector.shape_cast %50 : vector<20x1xi1> to vector<20x1xi1>
    %52 = vector.broadcast %51 : vector<20x1xi1> to vector<20x128xi1>
    %53 = vector.broadcast %cst_23 : f32 to vector<20x128xf32>
    %54 = arith.select %52, %40, %53 : vector<20x128xi1>, vector<20x128xf32>
    %55 = vector.extract_strided_slice %54 {offsets = [0, 0], sizes = [16, 128], strides = [1, 1]} : vector<20x128xf32> to vector<16x128xf32>
    %c0_24 = arith.constant 0 : index
    %c0_25 = arith.constant 0 : index
    %c0_26 = arith.constant 0 : index
    %56 = vector.load %arg7[%c0_24, %c0_25, %c0_26] : memref<3x128x128xf32, #tpu.memory_space<vmem>>, vector<1x128x128xf32>
    %57 = vector.shape_cast %56 : vector<1x128x128xf32> to vector<128x128xf32>
    %cst_27 = arith.constant dense<0.000000e+00> : vector<16x128xf32>
    %58 = tpu.matmul %55, %57, %cst_27 {dimension_numbers = #tpu.dot_dimension_numbers<[1], [0], [0], [1], [0, 0, 1, 1], [], []>} : vector<16x128xf32>, vector<128x128xf32>, vector<16x128xf32> -> vector<16x128xf32>
    %59 = vector.extract_strided_slice %54 {offsets = [2, 0], sizes = [16, 128], strides = [1, 1]} : vector<20x128xf32> to vector<16x128xf32>
    %c1_28 = arith.constant 1 : index
    %c0_29 = arith.constant 0 : index
    %c0_30 = arith.constant 0 : index
    %60 = vector.load %arg7[%c1_28, %c0_29, %c0_30] : memref<3x128x128xf32, #tpu.memory_space<vmem>>, vector<1x128x128xf32>
    %61 = vector.shape_cast %60 : vector<1x128x128xf32> to vector<128x128xf32>
    %cst_31 = arith.constant dense<0.000000e+00> : vector<16x128xf32>
    %62 = tpu.matmul %59, %61, %cst_31 {dimension_numbers = #tpu.dot_dimension_numbers<[1], [0], [0], [1], [0, 0, 1, 1], [], []>} : vector<16x128xf32>, vector<128x128xf32>, vector<16x128xf32> -> vector<16x128xf32>
    %63 = arith.addf %58, %62 : vector<16x128xf32>
    %64 = vector.extract_strided_slice %54 {offsets = [4, 0], sizes = [16, 128], strides = [1, 1]} : vector<20x128xf32> to vector<16x128xf32>
    %c2_32 = arith.constant 2 : index
    %c0_33 = arith.constant 0 : index
    %c0_34 = arith.constant 0 : index
    %65 = vector.load %arg7[%c2_32, %c0_33, %c0_34] : memref<3x128x128xf32, #tpu.memory_space<vmem>>, vector<1x128x128xf32>
    %66 = vector.shape_cast %65 : vector<1x128x128xf32> to vector<128x128xf32>
    %cst_35 = arith.constant dense<0.000000e+00> : vector<16x128xf32>
    %67 = tpu.matmul %64, %66, %cst_35 {dimension_numbers = #tpu.dot_dimension_numbers<[1], [0], [0], [1], [0, 0, 1, 1], [], []>} : vector<16x128xf32>, vector<128x128xf32>, vector<16x128xf32> -> vector<16x128xf32>
    %68 = arith.addf %63, %67 : vector<16x128xf32>
    %c0_36 = arith.constant 0 : index
    %c0_37 = arith.constant 0 : index
    %69 = vector.load %arg8[%c0_36, %c0_37] : memref<1x128xf32, #tpu.memory_space<vmem>>, vector<1x128xf32>
    %70 = vector.broadcast %69 : vector<1x128xf32> to vector<16x128xf32>
    %71 = arith.addf %68, %70 : vector<16x128xf32>
    %cst_38 = arith.constant 0.000000e+00 : f32
    %72 = vector.broadcast %cst_38 : f32 to vector<16x128xf32>
    %73 = arith.maximumf %71, %72 : vector<16x128xf32>
    %74 = vector.extract_strided_slice %21 {offsets = [4, 0], sizes = [16, 128], strides = [1, 1]} : vector<24x128xf32> to vector<16x128xf32>
    %c0_39 = arith.constant 0 : index
    %c0_40 = arith.constant 0 : index
    %75 = vector.load %arg9[%c0_39, %c0_40] : memref<128x128xf32, #tpu.memory_space<vmem>>, vector<128x128xf32>
    %cst_41 = arith.constant dense<0.000000e+00> : vector<16x128xf32>
    %76 = tpu.matmul %74, %75, %cst_41 {dimension_numbers = #tpu.dot_dimension_numbers<[1], [0], [0], [1], [0, 0, 1, 1], [], []>} : vector<16x128xf32>, vector<128x128xf32>, vector<16x128xf32> -> vector<16x128xf32>
    %c0_42 = arith.constant 0 : index
    %c0_43 = arith.constant 0 : index
    %77 = vector.load %arg10[%c0_42, %c0_43] : memref<1x128xf32, #tpu.memory_space<vmem>>, vector<1x128xf32>
    %78 = vector.broadcast %77 : vector<1x128xf32> to vector<16x128xf32>
    %79 = arith.addf %76, %78 : vector<16x128xf32>
    %80 = arith.addf %73, %79 : vector<16x128xf32>
    %cst_44 = arith.constant 0.000000e+00 : f32
    %81 = vector.broadcast %cst_44 : f32 to vector<16x128xf32>
    %82 = arith.maximumf %80, %81 : vector<16x128xf32>
    %c0_45 = arith.constant 0 : index
    %c0_46 = arith.constant 0 : index
    %c0_47 = arith.constant 0 : index
    %83 = vector.load %arg11[%c0_45, %c0_46, %c0_47] : memref<1x16x128xf32, #tpu.memory_space<vmem>>, vector<1x16x128xf32>
    %84 = vector.shape_cast %83 : vector<1x16x128xf32> to vector<16x128xf32>
    %85 = vector.shape_cast %82 : vector<16x128xf32> to vector<1x16x128xf32>
    tpu.vector_store %arg11[%c0_45, %c0_46, %c0_47], %85 {strides = array<i32>} : memref<1x16x128xf32, #tpu.memory_space<vmem>>, vector<1x16x128xf32>,
    return
  }
  func.func @transform_0(%arg0: i32, %arg1: i32) -> (i32, i32, i32) {
    %c2_i32 = arith.constant 2 : i32
    %0 = arith.muli %arg1, %c2_i32 : i32
    %c1_i32 = arith.constant 1 : i32
    %1 = arith.subi %0, %c1_i32 : i32
    %c0_i32 = arith.constant 0 : i32
    %2 = arith.maxsi %1, %c0_i32 : i32
    %c0_i32_0 = arith.constant 0 : i32
    %c0_i32_1 = arith.constant 0 : i32
    return %arg0, %2, %c0_i32_0 : i32, i32, i32
  }
  func.func @transform_1(%arg0: i32, %arg1: i32) -> (i32, i32, i32) {
    %c0_i32 = arith.constant 0 : i32
    %c0_i32_0 = arith.constant 0 : i32
    return %arg0, %arg1, %c0_i32 : i32, i32, i32
  }
  func.func @transform_2(%arg0: i32, %arg1: i32) -> (i32, i32, i32) {
    %c1_i32 = arith.constant 1 : i32
    %0 = arith.addi %arg1, %c1_i32 : i32
    %c2_i32 = arith.constant 2 : i32
    %1 = arith.muli %0, %c2_i32 : i32
    %c2_i32_0 = arith.constant 2 : i32
    %2 = arith.minsi %1, %c2_i32_0 : i32
    %c0_i32 = arith.constant 0 : i32
    %c0_i32_1 = arith.constant 0 : i32
    return %arg0, %2, %c0_i32 : i32, i32, i32
  }
  func.func @transform_3(%arg0: i32, %arg1: i32) -> (i32, i32, i32) {
    %c0_i32 = arith.constant 0 : i32
    %c0_i32_0 = arith.constant 0 : i32
    %c0_i32_1 = arith.constant 0 : i32
    %c0_i32_2 = arith.constant 0 : i32
    return %c0_i32, %c0_i32_0, %c0_i32_1 : i32, i32, i32
  }
  func.func @transform_4(%arg0: i32, %arg1: i32) -> (i32, i32) {
    %c0_i32 = arith.constant 0 : i32
    %c0_i32_0 = arith.constant 0 : i32
    %c0_i32_1 = arith.constant 0 : i32
    return %c0_i32, %c0_i32_0 : i32, i32
  }
  func.func @transform_5(%arg0: i32, %arg1: i32) -> (i32, i32, i32) {
    %c0_i32 = arith.constant 0 : i32
    %c0_i32_0 = arith.constant 0 : i32
    %c0_i32_1 = arith.constant 0 : i32
    %c0_i32_2 = arith.constant 0 : i32
    return %c0_i32, %c0_i32_0, %c0_i32_1 : i32, i32, i32
  }
  func.func @transform_6(%arg0: i32, %arg1: i32) -> (i32, i32) {
    %c0_i32 = arith.constant 0 : i32
    %c0_i32_0 = arith.constant 0 : i32
    %c0_i32_1 = arith.constant 0 : i32
    return %c0_i32, %c0_i32_0 : i32, i32
  }
  func.func @transform_7(%arg0: i32, %arg1: i32) -> (i32, i32) {
    %c0_i32 = arith.constant 0 : i32
    %c0_i32_0 = arith.constant 0 : i32
    %c0_i32_1 = arith.constant 0 : i32
    return %c0_i32, %c0_i32_0 : i32, i32
  }
  func.func @transform_8(%arg0: i32, %arg1: i32) -> (i32, i32) {
    %c0_i32 = arith.constant 0 : i32
    %c0_i32_0 = arith.constant 0 : i32
    %c0_i32_1 = arith.constant 0 : i32
    return %c0_i32, %c0_i32_0 : i32, i32
  }
  func.func @transform_9(%arg0: i32, %arg1: i32) -> (i32, i32, i32) {
    %c0_i32 = arith.constant 0 : i32
    %c0_i32_0 = arith.constant 0 : i32
    return %arg0, %arg1, %c0_i32 : i32, i32, i32
  }
}

</mosaic_0001>

<bundles_post_ra>
// kernel: tpu_custom_call.1
= control target key start
LH: loop header
LB: loop body
LE: loop exit
PB: predicated region body
PF: predicated region fallthrough
CT: control target
= control target key end

     0   :  { %s3151_s0 = inlined_call_operand.hbm [shape: f32[2,24,128], index: 0, kind: input, shape index: {}]   ;;  %s3152_s1 = inlined_call_operand.hbm [shape: f32[2,24,128], index: 1, kind: input, shape index: {}]   ;;  %s3153_s2 = inlined_call_operand.hbm [shape: f32[2,24,128], index: 2, kind: input, shape index: {}]   ;;  %s3154_s3 = inlined_call_operand.hbm [shape: f32[3,128,128], index: 3, kind: input, shape index: {}]   ;;  %s3155_s4 = inlined_call_operand.vmem [shape: f32[1,128], index: 4, kind: input, shape index: {}]   ;;  %s3156_s5 = inlined_call_operand.hbm [shape: f32[3,128,128], index: 5, kind: input, shape index: {}]   ;;  %s3157_s6 = inlined_call_operand.vmem [shape: f32[1,128], index: 6, kind: input, shape index: {}]   ;;  %s3158_s7 = inlined_call_operand.hbm [shape: f32[128,128], index: 7, kind: input, shape index: {}]   ;;  %s3159_s8 = inlined_call_operand.vmem [shape: f32[1,128], index: 8, kind: input, shape index: {}]   ;;  %s3160_s9 = inlined_call_operand.hbm [shape: f32[2,24,128], index: 9, kind: output, shape index: {}]  }
   0x1   :  { %3183 = sst [smem:[#allocation36_spill]] %s3154_s3 }
   0x2   :  { %3184 = sst [smem:[#allocation37_spill]] %s3155_s4 }
   0x3   :  { %3185 = sst [smem:[#allocation38_spill]] %s3156_s5 }
   0x4   :  { %3186 = sst [smem:[#allocation39_spill]] %s3157_s6 }
   0x5   :  { %3187 = sst [smem:[#allocation40_spill]] %s3158_s7 }
   0x6   :  { %3188 = sst [smem:[#allocation41_spill]] %s3159_s8 }
   0x7   :  { %3189 = sst [smem:[#allocation42_spill]] %s3160_s9 }
   0x8   :  { %14 = vsyncpa [#allocation3], 0 }
   0x9   :  { %16 = vsyncpa [#allocation3 + $0x1], 0 }
   0xa   :  { %17 = vsyncpa [#allocation6], 0 }
   0xb   :  { %19 = vsyncpa [#allocation6 + $0x1], 0 }
   0xc   :  { %20 = vsyncpa [#allocation9], 0 }
   0xd   :  { %21 = vsyncpa [#allocation12], 0 }
   0xe   :  { %22 = vsyncpa [#allocation4], 0 }
   0xf   :  { %24 = vsyncpa [#allocation4 + $0x1], 0  ;;  %s2537_s30 = smov 0   ;;  %s2539_s10 = smov 0  }
  0x10   :  { %s2541_s11 = smov 0   ;;  %s2543_s12 = smov 0  }
  0x11   :  { %s2545_s13 = smov 0   ;;  %s2547_s14 = smov 0  }
  0x12   :  { %s2549_s15 = smov 0   ;;  %s2551_s16 = smov 0  }
  0x13   :  { %s2553_s17 = smov 0   ;;  %s2555_s18 = smov 0  }
  0x14   :  { %s2557_s19 = smov 0   ;;  %s2559_s20 = smov 0  }
  0x15   :  { %s2561_s21 = smov 0   ;;  %s2563_s22 = smov 0  }
  0x16 LB: > { %3190 = sst [smem:[#allocation20_spill]] %s2422_s10  ;;  %s2608_s23 = sadd.s32 4294967295, %s2470_s22   ;;  %s2470_s22 = sphi %s2563_s22, %s30_s22   ;;  %s2466_s21 = sphi %s2561_s21, %s3268_s21   ;;  %s2462_s20 = sphi %s2559_s20, %s3258_s20   ;;  %s2458_s19 = sphi %s2557_s19, %s3267_s19   ;;  %s2454_s18 = sphi %s2555_s18, %s3257_s18   ;;  %s2450_s17 = sphi %s2553_s17, %s3266_s17   ;;  %s2446_s16 = sphi %s2551_s16, %s3265_s16   ;;  %s2442_s15 = sphi %s2549_s15, %s3264_s15   ;;  %s2438_s14 = sphi %s2547_s14, %s3263_s14   ;;  %s2434_s13 = sphi %s2545_s13, %s3262_s13   ;;  %s2430_s12 = sphi %s2543_s12, %s3254_s12   ;;  %s2426_s11 = sphi %s2541_s11, %s3261_s11   ;;  %s2422_s10 = sphi %s2539_s10, %s3260_s10   ;;  %s2418_s30 = sphi %s2537_s30, %s3252_s30  }
  0x17   : > { %3191 = sst [smem:[#allocation21_spill]] %s2430_s12  ;;  %s39_s25 = sadd.s32 1, %s2462_s20 }
  0x18   : > { %3192 = sst [smem:[#allocation22_spill]] %s2434_s13  ;;  %s42_s26 = sadd.s32 1, %s2466_s21 }
  0x19   : > { %3193 = sst [smem:[#allocation23_spill]] %s2454_s18  ;;  %p40_p0 = scmp.ge.s32.totalorder %s39_s25, 2 }
  0x1a   : > { %3194 = sst [smem:[#allocation24_spill]] %s2458_s19  ;;  %s2614_s27 = sshll.u32 %s2462_s20, 1 }
  0x1b   : > { %3195 = sst [smem:[#allocation25_spill]] %s2462_s20  ;;  %s1535_s28 = sadd.s32 4294967295, %s2614_s27 }
  0x1c   : > { %3196 = sst [smem:[#allocation26_spill]] %s2608_s23  ;;  %s59_s29 = sadd.s32 1, %s2450_s17 }
  0x1d   : > { %s3270_s25 = smov (%p40_p0, %s39_s25), 0  ;;  %s3272_s26 = smov (!%p40_p0, %s42_s26), %s2466_s21 }
  0x1e   : > { %3197 = sst [smem:[#allocation27_spill]] %s3270_s25  ;;  %p48_p1 = scmp.gt.s32.totalorder %s1535_s28, 0 }
  0x1f   : > { %s1536_s24 = sshll.u32 %s3270_s25, 1  ;;  %p44_p2 = scmp.ge.s32.totalorder %s3272_s26, 2 }
  0x20   : > { %s1537_s9 = sadd.s32 4294967295, %s1536_s24  ;;  %s3274_s28 = smov (!%p48_p1, %s1535_s28), 0 }
  0x21   : > { %s3276_s26 = smov (%p44_p2, %s3272_s26), 0  ;;  %p52_p3 = scmp.gt.s32.totalorder %s1537_s9, 0 }
  0x22   : > { %3198 = sst [smem:[#allocation28_spill]] %s3276_s26  ;;  %p66_p4 = scmp.ne.s32.totalorder %s2450_s17, %s2446_s16 }
  0x23   : > { %s2630_s19 = ssub.s32 %s2466_s21, %s3276_s26  ;;  %p67_p5 = scmp.eq.s32.totalorder %s2470_s22, 0 }
  0x24   : > { %s3278_s9 = smov (!%p52_p3, %s1537_s9), 0  ;;  %p72_p7 = scmp.ne.s32.totalorder %s2446_s16, %s2442_s15 }
  0x25   : > { %p2635_p6 = por %p67_p5, %p66_p4  ;;  %s55_s26 = ssub.s32 %s3274_s28, %s3278_s9 }
  0x26   : > { %p3174_p8 = scmp.eq.s32.totalorder %s2608_s23, 0  ;;  %s56_s8 = sor.u32 %s55_s26, %s2630_s19 }
  0x27   : > { %s83_s6 = ssub.s32 %s2462_s20, %s3270_s25  ;;  %p57_p9 = scmp.eq.s32.totalorder %s56_s8, 0 }
  0x28   : > { %p2648_p10 = por %p3174_p8, %p72_p7  ;;  %s84_s15 = sor.u32 %s83_s6, %s2630_s19 }
  0x29   : > { %s87_s18 = sadd.s32 1, %s2438_s14  ;;  %p85_p11 = scmp.eq.s32.totalorder %s84_s15, 0 }
  0x2a   : > { %s3200_s4 = scalar_select %p2648_p10, 1, 0 }
  0x2b   : > { %s2655_s9 = scalar_select %p57_p9, %s2450_s17, %s59_s29  }
  0x2c   : > { %p94_p12 = scmp.ne.s32.totalorder %s2438_s14, %s2434_s13  ;;  %p3164_p13 = scmp.ne.s32.totalorder %s2434_s13, %s2430_s12 }
  0x2d   : > { %3201 = sst [smem:[#allocation29_spill]] %s2655_s9  ;;  %s123_s29 = sadd.s32 1, %s2426_s11 }
  0x2e   : > { %s2662_s8 = scalar_select %p85_p11, %s2438_s14, %s87_s18  }
  0x2f   : > { %p2666_p0 = por %p94_p12, %p67_p5  ;;  %p2675_p1 = por %p3164_p13, %p3174_p8 }
  0x30   : > { %3202 = sst [smem:[#allocation30_spill]] %s2662_s8  ;;  %p130_p2 = scmp.ne.s32.totalorder %s2426_s11, %s2422_s10 }
  0x31   : > { %s3203_s26 = scalar_select %p2666_p0, 1, 0 }
  0x32   : > { %s3204_s6 = scalar_select %p2675_p1, 1, 0 }
  0x33   : > { %p136_p3 = scmp.ne.s32.totalorder %s2422_s10, %s2418_s30  ;;  %p288_p4 = scmp.eq.s32.totalorder %s2608_s23, 3 }
  0x34   : > { %3205 = sst [smem:[#allocation31_spill]] %s3204_s6  ;;  %p2687_p7 = por %p130_p2, %p67_p5 }
  0x35   : > { %p121_p9 = scmp.eq.s32.totalorder %s2630_s19, 0  ;;  %p2694_p11 = por %p136_p3, %p3174_p8 }
  0x36   : > { %s3206_s15 = scalar_select %p2687_p7, 1, 0 }
  0x37   : > { %s3207_s18 = scalar_select %p2694_p11, 1, 0 }
  0x38   : > { %p2698_p13 = por %p288_p4, %p94_p12  ;;  %s3211_s20 = sadd.s32 4294967294, %s2470_s22  }
  0x39   : > { %3208 = sst [smem:[#allocation32_spill]] %s3207_s18  ;;  %p294_p1 = scmp.eq.s32.totalorder %s3211_s20, 3 }
  0x3a   : > { %s3209_s25 = scalar_select %p2698_p13, 1, 0 }
  0x3b   : > { %s2705_s30 = scalar_select %p121_p9, %s2426_s11, %s123_s29  }
  0x3c   : > { %3210 = sst [smem:[#allocation33_spill]] %s3209_s25  ;;  %p3213_p10 = scmp.ne.s32.totalorder %s2434_s13, %s2430_s12 }
  0x3d   : > { %3212 = sst [smem:[#allocation34_spill]] %s2705_s30  ;;  %p1540_p2 = scmp.ge.s32.totalorder %s2470_s22, 1 }
  0x3e   : > { %p2710_p5 = por %p294_p1, %p3213_p10  ;;  %p301_p7 = scmp.lt.s32.totalorder %s2470_s22, 5 }
  0x3f   : > { %s2472_s8 = smov [#allocation8]   ;;  %s2473_s20 = smov [#allocation10]  }
  0x40   : > { %s3214_s9 = scalar_select %p2710_p5, 1, 0 }
  0x41   : > { %p2716_p0 = pnand %p1540_p2, %p301_p7  ;;  %s313_s18 = sshll.u32 %s2472_s8, 4  ;;  %s314_s18 = int_to_ptr.vmem [resolvable:$true] %s313_s18 }
  0x42   : > { %3215 = sst [smem:[#allocation35_spill]] %s3214_s9  ;;  %s329_s29 = sshll.u32 %s2473_s20, 4  ;;  %s2728_s29 = int_to_ptr.vmem [resolvable:$true] %s329_s29 }
  0x43   : > { %p2007_p12 = pneg %p2716_p0  ;;  %s2474_s9 = smov [#allocation11]  }
  0x44   : > { %s345_s12 = sshll.u32 %s2474_s9, 4  ;;  %s2162_s8 = scalar_lea.vmem %s314_s18, 6144  ;;  %s2730_s12 = int_to_ptr.vmem [resolvable:$true] %s345_s12 }
  0x45   : > { %p2724_p3 = pnand %p2007_p12, %p3174_p8  ;;  %p2163_p1 = scmp.ne.s32.totalorder %s314_s18, %s2162_s8 }
  0x46   : > { %p2170_p9 = scmp.lt.s32.totalorder %s314_s18, %s314_s18  ;;  %p2171_p2 = scmp.lt.s32.totalorder %s2162_s8, %s2162_s8 }
  0x47   : > { %p2153_p10 = pneg %p2724_p3 }
  0x48   : > { %p2172_p12 = por %p2171_p2, %p2170_p9 }
  0x49   : > { %p2165_p4 = pnand %p2163_p1, %p2153_p10 }
  0x4b   : > { %p2166_p7 = pneg %p2165_p4 }
  0x4d   : > { %p2173_p8 = pnand %p2172_p12, %p2166_p7 }
  0x4f   : > { %2176 = shalt.err (!%p2173_p8)
}
  0x50   : > { %s2475_s20 = smov 128   ;;  %s2476_s9 = smov 8  }
  0x51   : > { %s3218_s3 = sld [smem:[#allocation36_spill]]  ;;  %s2188_s6 = scalar_lea.vmem %s2728_s29, 6144 }
  0x52   : > { %p2189_p1 = scmp.ne.s32.totalorder %s2728_s29, %s2188_s6  ;;  %p2196_p8 = scmp.lt.s32.totalorder %s2728_s29, %s2728_s29 }
  0x53   : > { %p2197_p7 = scmp.lt.s32.totalorder %s2188_s6, %s2188_s6 }
  0x54   : > { %p2191_p4 = pnand %p2189_p1, %p2153_p10 }
  0x55   : > { %p2198_p2 = por %p2197_p7, %p2196_p8 }
  0x56   : > { %p2192_p9 = pneg %p2191_p4 }
  0x57   : > { %2010 = dma.hbm_to_vmem [thread:$0]  (!%p2724_p3), %s3218_s3, 6144, %s314_s18, [#allocation9], %s2475_s20, %s2475_s20, %s2476_s9  }
  0x58   : > { %p2199_p12 = pnand %p2198_p2, %p2192_p9 }
  0x5a   : > { %2202 = shalt.err (!%p2199_p12)
}
  0x5b   : > { %s3219_s5 = sld [smem:[#allocation38_spill]]  ;;  %s2214_s10 = scalar_lea.vmem %s2730_s12, 2048 }
  0x5c   : > { %p2215_p1 = scmp.ne.s32.totalorder %s2730_s12, %s2214_s10  ;;  %p2222_p9 = scmp.lt.s32.totalorder %s2730_s12, %s2730_s12 }
  0x5d   : > { %p2223_p8 = scmp.lt.s32.totalorder %s2214_s10, %s2214_s10 }
  0x5e   : > { %p2217_p4 = pnand %p2215_p1, %p2153_p10 }
  0x5f   : > { %p2224_p7 = por %p2223_p8, %p2222_p9 }
  0x60   : > { %p2218_p5 = pneg %p2217_p4 }
  0x61   : > { %2013 = dma.hbm_to_vmem [thread:$0]  (!%p2724_p3), %s3219_s5, 6144, %s2728_s29, [#allocation9], %s2475_s20, %s2475_s20, %s2476_s9  }
  0x62   : > { %p2225_p2 = pnand %p2224_p7, %p2218_p5 }
  0x64   : > { %2228 = shalt.err (!%p2225_p2)
}
  0x65   : > { %s3220_s7 = sld [smem:[#allocation40_spill]]  ;;  %p1544_p12 = scmp.ge.s32.totalorder %s2470_s22, 4 }
  0x66   : > { %s362_s6 = sand.u32 (!%p1544_p12), 1, %s2450_s17   ;;  %s1985_s18 = smul.u32 (!%p1544_p12), 3, %s2466_s21 }
  0x67   : > { %358 = sbr.rel (%p1544_p12) target bundleno = 181 (0xb5), region = 40  ;;  %s1545_s29 = sshll.u32 (!%p1544_p12), %s362_s6, 3 }
  0x68   : > { %s375_s8 = sadd.s32 (!%p1544_p12), %s1985_s18, %s3274_s28  ;;  %s366_s30 = scalar_lea.vmem (!%p1544_p12), [#allocation2], %s1545_s29 }
  0x69   : > { %s1548_s10 = sshll.u32 (!%p1544_p12), %s375_s8, 7  ;;  %s379_s3 = sshll.u32 (!%p1544_p12), %s366_s30, 4  ;;  %s380_s3 = int_to_ptr.vmem [resolvable:$true] %s379_s3 }
  0x6a   : > { %s2477_s13 = smov (!%p1544_p12), [#allocation2]  }
  0x6b   : > { %2016 = dma.hbm_to_vmem [thread:$0]  (!%p2724_p3), %s3220_s7, 2048, %s2730_s12, [#allocation12], %s2475_s20, %s2475_s20, %s2476_s9  }
  0x6c   : > { %s377_s12 = scalar_lea.hbm %s3151_s0, %s1548_s10  ;;  %s363_s20 = scalar_lea.sflag [#allocation3], %s362_s6 }
  0x6d   : > { %s2241_s9 = scalar_lea.vmem %s380_s3, 128  ;;  %s2245_s25 = sshll.u32 %s2477_s13, 4  ;;  %s2246_s25 = int_to_ptr.vmem [resolvable:$false] %s2245_s25 }
  0x6e   : > { %p2242_p5 = scmp.ne.s32.totalorder %s380_s3, %s2241_s9  ;;  %s2247_s7 = scalar_lea.vmem %s2246_s25, 256 }
  0x6f   : > { %p2248_p1 = scmp.lt.s32.totalorder %s380_s3, %s2246_s25  ;;  %p2249_p4 = scmp.lt.s32.totalorder %s2247_s7, %s2241_s9 }
  0x70   : > { %p2243_p3 = pnand %p2242_p5, %p2635_p6 }
  0x71   : > { %p2250_p9 = por %p2249_p4, %p2248_p1 }
  0x72   : > { %p2244_p10 = pneg %p2243_p3 }
  0x74   : > { %p2251_p8 = pnand %p2250_p9, %p2244_p10 }
  0x76   : > { %2254 = shalt.err (!%p2251_p8)
}
  0x77   : > { %1995 = dma.hbm_to_vmem [thread:$0]  (%p2635_p6), %s377_s12, 128, %s380_s3, %s363_s20  }
  0x78   : > { %p3221_p7 = scmp.ne.s32.totalorder %s3203_s26, 0 }
  0x79   : > { %s386_s5 = sand.u32 (%p3221_p7), 1, %s2470_s22   ;;  %s388_s23 = sand.u32 (%p3221_p7), 1, %s2438_s14  }
  0x7a   : > { %385 = sbr.rel (!%p3221_p7) target bundleno = 155 (0x9b), region = 48  ;;  %s1549_s28 = sshll.u32 (%p3221_p7), %s388_s23, 4 }
  0x7b   : > { %s392_s6 = ssub.s32 (%p3221_p7), 3, %s2614_s27  ;;  %s2789_s8 = scalar_lea.sflag (%p3221_p7), [#allocation6], %s386_s5 }
  0x7c   : > { %p393_p2 = scmp.lt.s32.totalorder (%p3221_p7), %s392_s6, 2  ;;  %s390_s3 = scalar_lea.vmem (%p3221_p7), [#allocation5], %s1549_s28 }
  0x7f   : > { %s3280_s6 = smov (!%p393_p2, %s392_s6), 2 }
  0x80   : > { %s2786_s29 = sshll.u32 %s3280_s6, 7 }
  0x81   : > { %s397_s7 = ssub.s32 256, %s2786_s29 }
  0x82   : > { %398 = vsyncadd %s2789_s8, %s397_s7  ;;  %p1552_p6 = scmp.ne.s32.totalorder %s2786_s29, 0  ;;  %s401_s24 = sadd.s32 %s1985_s18, %s2614_s27 }
  0x83   : > { %s1553_s26 = sshll.u32 %s401_s24, 7  ;;  %s405_s10 = sshll.u32 %s390_s3, 4  ;;  %s2801_s10 = int_to_ptr.vmem [resolvable:$true] %s405_s10 }
  0x84   : > { %s2799_s20 = scalar_lea.hbm %s3152_s1, %s1553_s26  ;;  %s2259_s27 = scalar_lea.hbm %s3152_s1, 768 }
  0x85   : > { %s2255_s9 = scalar_lea.hbm %s2799_s20, %s2786_s29 }
  0x86   : > { %p2256_p12 = scmp.ne.s32.totalorder %s2799_s20, %s2255_s9  ;;  %p2261_p10 = scmp.lt.s32.totalorder %s2259_s27, %s2255_s9 }
  0x88   : > { %p2257_p5 = pnand %p2256_p12, %p1552_p6 }
  0x8a   : > { %p2258_p3 = pneg %p2257_p5 }
  0x8c   : > { %p2263_p1 = pnand %p2261_p10, %p2258_p3 }
  0x8e   : > { %2266 = shalt.err (!%p2263_p1)
}
  0x8f   : > { %s2267_s18 = scalar_lea.vmem %s2801_s10, %s2786_s29  ;;  %s2478_s5 = smov [#allocation5]  }
  0x90   : > { %p2268_p4 = scmp.ne.s32.totalorder %s2801_s10, %s2267_s18  ;;  %s2271_s23 = sshll.u32 %s2478_s5, 4  ;;  %s2272_s23 = int_to_ptr.vmem [resolvable:$false] %s2271_s23 }
  0x91   : > { %s2273_s28 = scalar_lea.vmem %s2272_s23, 512  ;;  %p2274_p7 = scmp.lt.s32.totalorder %s2801_s10, %s2272_s23 }
  0x92   : > { %p2269_p9 = pnand %p2268_p4, %p1552_p6  ;;  %p2275_p2 = scmp.lt.s32.totalorder %s2273_s28, %s2267_s18 }
  0x94   : > { %p2270_p8 = pneg %p2269_p9  ;;  %p2276_p12 = por %p2275_p2, %p2274_p7 }
  0x96   : > { %p2277_p5 = pnand %p2276_p12, %p2270_p8 }
  0x98   : > { %2280 = shalt.err (!%p2277_p5)
}
  0x99   : > { %s2479_s6 = smov 128   ;;  %s2480_s7 = smov 8  }
  0x9a   : > { %411 = dma.hbm_to_vmem [thread:$0]  (%p1552_p6), %s2799_s20, %s2786_s29, %s2801_s10, %s2789_s8, %s2479_s6, %s2479_s6, %s2480_s7  }
  0x9b PF: > { %s415_s3 = sand.u32 1, %s2470_s22   ;;  %s417_s24 = sand.u32 1, %s2426_s11  }
  0x9c   : > { %s1556_s26 = sshll.u32 %s417_s24, 3  ;;  %s2415_s30 = smul.u32 384, %s2466_s21 }
  0x9d   : > { %s419_s9 = scalar_lea.vmem [#allocation7], %s1556_s26  ;;  %s416_s5 = scalar_lea.sflag [#allocation6], %s415_s3 }
  0x9e   : > { %s2414_s12 = sadd.s32 256, %s2415_s30  ;;  %s432_s13 = sshll.u32 %s419_s9, 4  ;;  %s433_s13 = int_to_ptr.vmem [resolvable:$true] %s432_s13 }
  0x9f   : > { %s430_s18 = scalar_lea.hbm %s3153_s2, %s2414_s12  ;;  %p3222_p3 = scmp.ne.s32.totalorder %s3206_s15, 0 }
  0xa0   : > { %s2281_s23 = scalar_lea.hbm %s430_s18, 128  ;;  %s2285_s10 = scalar_lea.hbm %s3153_s2, 768 }
  0xa1   : > { %p2282_p6 = scmp.ne.s32.totalorder %s430_s18, %s2281_s23  ;;  %p2287_p4 = scmp.lt.s32.totalorder %s2285_s10, %s2281_s23 }
  0xa3   : > { %p2283_p10 = pnand %p2282_p6, %p3222_p3 }
  0xa5   : > { %p2284_p1 = pneg %p2283_p10 }
  0xa7   : > { %p2289_p9 = pnand %p2287_p4, %p2284_p1 }
  0xa9   : > { %2292 = shalt.err (!%p2289_p9)
}
  0xaa   : > { %s2293_s20 = scalar_lea.vmem %s433_s13, 128  ;;  %s2481_s28 = smov [#allocation7]  }
  0xab   : > { %p2294_p8 = scmp.ne.s32.totalorder %s433_s13, %s2293_s20  ;;  %s2297_s6 = sshll.u32 %s2481_s28, 4  ;;  %s2298_s6 = int_to_ptr.vmem [resolvable:$false] %s2297_s6 }
  0xac   : > { %s2299_s7 = scalar_lea.vmem %s2298_s6, 256  ;;  %p2300_p12 = scmp.lt.s32.totalorder %s433_s13, %s2298_s6 }
  0xad   : > { %p2295_p7 = pnand %p2294_p8, %p3222_p3  ;;  %p2301_p5 = scmp.lt.s32.totalorder %s2299_s7, %s2293_s20 }
  0xaf   : > { %p2296_p2 = pneg %p2295_p7  ;;  %p2302_p6 = por %p2301_p5, %p2300_p12 }
  0xb1   : > { %p2303_p10 = pnand %p2302_p6, %p2296_p2 }
  0xb3   : > { %2306 = shalt.err (!%p2303_p10)
}
  0xb4   : > { %1996 = dma.hbm_to_vmem [thread:$0]  (%p3222_p3), %s430_s18, 128, %s433_s13, %s416_s5  }
  0xb5 PF: > { %441 = sbr.rel (%p2716_p0) target bundleno = 756 (0x2f4), region = 56  ;;  %s443_s3 = sand.u32 (!%p2716_p0), 1, %s2446_s16  }
  0xb6   : > { %s2841_s24 = sshll.u32 (!%p2716_p0), %s443_s3, 3  ;;  %s444_s26 = scalar_lea.sflag (!%p2716_p0), [#allocation3], %s443_s3 }
  0xb7   : > { %s447_s30 = scalar_lea.vmem (!%p2716_p0), [#allocation2], %s2841_s24  ;;  %p3223_p1 = scmp.ne.s32.totalorder (!%p2716_p0), %s3200_s4, 0 }
  0xba   : > { %2390 = dma.done.wait (%p3223_p1), %s444_s26, 128  }
  0xbb   : > { %2392 = vsyncadd (%p3223_p1), %s444_s26, 4294967168  ;;  %s3224_s12 = sld [smem:[#allocation26_spill]] }
  0xbc   : > { %s3225_s15 = sld [smem:[#allocation22_spill]] }
  0xbd   : > { %s3226_s9 = sld [smem:[#allocation31_spill]] }
  0xc1   : > { %s452_s13 = sand.u32 1, %s3224_s12  }
  0xc2   : > { %s454_s19 = sand.u32 1, %s3225_s15   ;;  %s453_s27 = scalar_lea.sflag [#allocation6], %s452_s13 }
  0xc3   : > { %s2852_s25 = sshll.u32 %s454_s19, 4  ;;  %p3227_p0 = scmp.ne.s32.totalorder %s3226_s9, 0 }
  0xc4   : > { %s456_s18 = scalar_lea.vmem [#allocation5], %s2852_s25 }
  0xc5   : > { %2394 = dma.done.wait (%p3227_p0), %s453_s27, 256  }
  0xc6   : > { %2396 = vsyncadd (%p3227_p0), %s453_s27, 4294967040  ;;  %s3228_s5 = sld [smem:[#allocation20_spill]] }
  0xcc   : > { %s463_s23 = sand.u32 1, %s3228_s5  }
  0xcd   : > { %s2860_s29 = sshll.u32 %s463_s23, 3 }
  0xce   : > { %s465_s8 = scalar_lea.vmem [#allocation7], %s2860_s29 }
  0xcf   : > { %2398 = dma.done.wait (%p2694_p11), %s453_s27, 128  }
  0xd0   : > { %2400 = vsyncadd (%p2694_p11), %s453_s27, 4294967168  ;;  %p3230_p3 = scmp.eq.s32.totalorder %s3224_s12, 0 }
  0xd2   : > { %2402 = dma.done.wait (%p3230_p3), [#allocation9], 12288   ;;  %p3231_p4 = pmov %p3230_p3 }
  0xd3   : > { %p3232_p9 = pmov %p3230_p3 }
  0xd4   : > { %2404 = vsyncadd (%p3231_p4), [#allocation9], 4294955008 }
  0xd5   : > { %2406 = dma.done.wait (%p3232_p9), [#allocation12], 2048   ;;  %p3233_p8 = pmov %p3230_p3 }
  0xd6   : > { %s3234_s10 = sld [smem:[#allocation23_spill]]  ;;  %v2482_v0 = vmov 0.0   ;;  %vm2483_vm0 = vmmov 0   ;;  %v560_v1 = vlaneseq  ;;  %v618_v2 = vld [vmem:[#allocation8 + $0xf8] sm:$0xff]  ;;  %v617_v4 = vld [vmem:[#allocation8 + $0xf0] sm:$0xff]  ;;  %v616_v6 = vld [vmem:[#allocation8 + $0xe8] sm:$0xff] }
  0xd7   : > { %2408 = vsyncadd (%p3233_p8), [#allocation12], 4294965248  ;;  %1722 = vmatprep.subr.mxu0 %v2482_v0  ;;  %1763 = vmatprep.subr.mxu1 %v2482_v0  ;;  %v601_v3 = vld [vmem:[#allocation8 + $0x78] sm:$0xff]  ;;  %v600_v5 = vld [vmem:[#allocation8 + $0x70] sm:$0xff]  ;;  %vm546_vm1 = vcmask 1043456   ;;  %vm622_vm11 = vcmask 1045504  }
  0xd8   : > { %1754 = vmatprep.mubr.msk.f32.mxu0 %vm2483_vm0, %v2482_v0  ;;  %1795 = vmatprep.mubr.msk.f32.mxu1 %vm2483_vm0, %v2482_v0  ;;  %v599_v7 = vld [vmem:[#allocation8 + $0x68] sm:$0xff]  ;;  %v2884_v8 = vshrl.u32 %v560_v1, 7  ;;  %v615_v9 = vld [vmem:[#allocation8 + $0xe0] sm:$0xff]  ;;  %v614_v11 = vld [vmem:[#allocation8 + $0xd8] sm:$0xff]  ;;  %s3241_s24 = sld [smem:[#allocation37_spill]]  ;;  %s3057_s5 = scalar_lea.sflag [#allocation4], %s454_s19 }
  0xd9   : > { %1723 = vmatpush3.msra.mxu0 %v618_v2  ;;  %1764 = vmatpush3.msra.mxu1 %v601_v3  ;;  %v598_v10 = vld [vmem:[#allocation8 + $0x60] sm:$0xff]  ;;  %v597_v12 = vld [vmem:[#allocation8 + $0x58] sm:$0xff]  ;;  %v613_v15 = vld [vmem:[#allocation8 + $0xd0] sm:$0xff]  ;;  %s3242_s12 = sld [smem:[#allocation39_spill]] }
  0xda   : > { %1724 = vmatprep.subr.mxu0 %v2482_v0  ;;  %1765 = vmatprep.subr.mxu1 %v2482_v0  ;;  %v2893_v13 = vadd.s32 8, %v2884_v8  ;;  %v596_v16 = vld [vmem:[#allocation8 + $0x50] sm:$0xff]  ;;  %v612_v17 = vld [vmem:[#allocation8 + $0xc8] sm:$0xff]  ;;  %v611_v20 = vld [vmem:[#allocation8 + $0xc0] sm:$0xff]  ;;  %v2908_v25 = vadd.s32 16, %v2884_v8  ;;  %s3243_s27 = sld [smem:[#allocation41_spill]] }
  0xdb   : > { %1725 = vmatpush3.msra.mxu0 %v617_v4  ;;  %1766 = vmatpush3.msra.mxu1 %v600_v5  ;;  %v595_v18 = vld [vmem:[#allocation8 + $0x48] sm:$0xff]  ;;  %v594_v22 = vld [vmem:[#allocation8 + $0x40] sm:$0xff]  ;;  %v610_v26 = vld [vmem:[#allocation8 + $0xb8] sm:$0xff]  ;;  %s3245_s23 = sld [smem:[#allocation23_spill]] (%p2698_p13) }
  0xdc   : > { %s1567_s20 = sshll.u32 %s3234_s10, 4  ;;  %1726 = vmatprep.subr.mxu0 %v2482_v0  ;;  %1767 = vmatprep.subr.mxu1 %v2482_v0  ;;  %v541_v23 = vld [vmem:[%s456_s18] sm:$0xff]  ;;  %v542_v24 = vld [vmem:[%s456_s18 + $0x8] sm:$0xff]  ;;  %s521_s18 = scalar_lea.vmem [#allocation13], %s2852_s25 }
  0xdd   : > { %s1568_s28 = sadd.s32 4294967292, %s1567_s20  ;;  %1727 = vmatpush3.msra.mxu0 %v616_v6  ;;  %1768 = vmatpush3.msra.mxu1 %v599_v7  ;;  %v593_v27 = vld [vmem:[#allocation8 + $0x38] sm:$0xff]  ;;  %v609_v28 = vld [vmem:[#allocation8 + $0xb0] sm:$0xff]  ;;  %v547_v29 = vrot.slane %v541_v23, 4  ;;  %v548_v30 = vrot.slane %v542_v24, 4  ;;  %v608_v35 = vld [vmem:[#allocation8 + $0xa8] sm:$0xff] }
  0xde   : > { %1728 = vmatprep.subr.mxu0 %v2482_v0  ;;  %1769 = vmatprep.subr.mxu1 %v2482_v0  ;;  %v564_v14 = vstv %s1568_s28  ;;  %v592_v31 = vld [vmem:[#allocation8 + $0x30] sm:$0xff]  ;;  %v540_v32 = vld [vmem:[%s447_s30 + $0x4] sm:$0xf]  ;;  %v606_v44 = vld [vmem:[#allocation8 + $0x98] sm:$0xff]  ;;  %s1573_s6 = sadd.s32 4294967294, %s1567_s20 }
  0xdf   : > { %1729 = vmatpush3.msra.mxu0 %v615_v9  ;;  %1770 = vmatpush3.msra.mxu1 %v598_v10  ;;  %v565_v19 = vadd.s32 %v564_v14, %v2884_v8  ;;  %v566_v21 = vadd.s32 %v564_v14, %v2893_v13  ;;  %v543_v33 = vld [vmem:[%s465_s8] sm:$0xf]  ;;  %v567_v34 = vadd.s32 %v564_v14, %v2908_v25  ;;  %v591_v36 = vld [vmem:[#allocation8 + $0x28] sm:$0xff]  ;;  %v607_v42 = vld [vmem:[#allocation8 + $0xa0] sm:$0xff] }
  0xe0   : > { %1730 = vmatprep.subr.mxu0 %v2482_v0  ;;  %1771 = vmatprep.subr.mxu1 %v2482_v0  ;;  %v2927_v38 = vsel %vm546_vm1, %v547_v29, %v548_v30  ;;  %v556_v39 = vsel %vm546_vm1, %v540_v32, %v547_v29  ;;  %v554_v41 = vrot.slane %v543_v33, 4  ;;  %v590_v43 = vld [vmem:[#allocation8 + $0x20] sm:$0xff]  ;;  %v589_v45 = vld [vmem:[#allocation8 + $0x18] sm:$0xff]  ;;  %v605_v50 = vld [vmem:[#allocation8 + $0x90] sm:$0xff] }
  0xe1   : > { %1731 = vmatpush3.msra.mxu0 %v614_v11  ;;  %1772 = vmatpush3.msra.mxu1 %v597_v12  ;;  %vm568_vm2 = vcmp.ge.s32.totalorder %v565_v19, 0  ;;  %vm569_vm3 = vcmp.ge.s32.totalorder %v566_v21, 0  ;;  %vm571_vm4 = vcmp.lt.s32.totalorder %v565_v19, 24  ;;  %vm572_vm5 = vcmp.lt.s32.totalorder %v566_v21, 24  ;;  %v588_v51 = vld [vmem:[#allocation8 + $0x10] sm:$0xff]  ;;  %v604_v54 = vld [vmem:[#allocation8 + $0x88] sm:$0xff] }
  0xe2   : > { %1732 = vmatprep.subr.mxu0 %v2482_v0  ;;  %1773 = vmatprep.subr.mxu1 %v2482_v0  ;;  %vm2922_vm6 = vmand %vm568_vm2, %vm571_vm4  ;;  %vm570_vm8 = vcmp.ge.s32.totalorder %v567_v34, 0  ;;  %vm573_vm9 = vcmp.lt.s32.totalorder %v567_v34, 24  ;;  %v557_v48 = vsel %vm546_vm1, %v548_v30, %v554_v41  ;;  %v587_v55 = vld [vmem:[#allocation8 + $0x8] sm:$0xff]  ;;  %v603_v57 = vld [vmem:[#allocation8 + $0x80] sm:$0xff]  ;;  %s1579_s29 = sshll.u32 (%p2698_p13), %s3245_s23, 1 }
  0xe3   : > { %1733 = vmatpush3.msra.mxu0 %v613_v15  ;;  %1774 = vmatpush3.msra.mxu1 %v596_v16  ;;  %vm2931_vm7 = vmand %vm569_vm3, %vm572_vm5  ;;  %v2941_v46 = vsel %vm2922_vm6, %v556_v39, 0.0  ;;  %v586_v58 = vld [vmem:[#allocation8] sm:$0xff]  ;;  %v807_v61 = vld [vmem:[#allocation8 + $0x178] sm:$0xff]  ;;  %s1353_s8 = ssub.s32 (%p2698_p13), 3, %s1579_s29 }
  0xe4   : > { %1734 = vmatprep.subr.mxu0 %v2482_v0  ;;  %1775 = vmatprep.subr.mxu1 %v2482_v0  ;;  %v2946_v47 = vsel %vm2931_vm7, %v2927_v38, 0.0  ;;  %vm2949_vm10 = vmand %vm570_vm8, %vm573_vm9  ;;  %v623_v52 = vrot.slane %v2941_v46, 2  ;;  %v806_v62 = vld [vmem:[#allocation8 + $0x170] sm:$0xff]  ;;  %v805_v1 = vld [vmem:[#allocation8 + $0x168] sm:$0xff]  ;;  %v808_v15 = vrot.slane %v2941_v46, 4  ;;  %p1354_p11 = scmp.lt.s32.totalorder (%p2698_p13), %s1353_s8, 2 }
  0xe5   : > { %1735 = vmatpush3.msra.mxu0 %v612_v17  ;;  %1776 = vmatpush3.msra.mxu1 %v595_v18  ;;  %v624_v53 = vrot.slane %v2946_v47, 2  ;;  %v2961_v56 = vsel %vm2949_vm10, %v557_v48, 0.0  ;;  %v804_v2 = vld [vmem:[#allocation8 + $0x160] sm:$0xff]  ;;  %v803_v3 = vld [vmem:[#allocation8 + $0x158] sm:$0xff]  ;;  %v802_v4 = vld [vmem:[#allocation8 + $0x150] sm:$0xff]  ;;  %v809_v16 = vrot.slane %v2946_v47, 4 }
  0xe6   : > { %1736 = vmatprep.subr.mxu0 %v2482_v0  ;;  %1777 = vmatprep.subr.mxu1 %v2482_v0  ;;  %v626_v60 = vrot.slane %v2961_v56, 2  ;;  %v801_v5 = vld [vmem:[#allocation8 + $0x148] sm:$0xff]  ;;  %v800_v6 = vld [vmem:[#allocation8 + $0x140] sm:$0xff]  ;;  %v799_v7 = vld [vmem:[#allocation8 + $0x138] sm:$0xff] }
  0xe7   : > { %1737 = vmatpush3.msra.mxu0 %v611_v20  ;;  %1778 = vmatpush3.msra.mxu1 %v594_v22  ;;  %v625_v59 = vsel %vm622_vm11, %v623_v52, %v624_v53  ;;  %v798_v9 = vld [vmem:[#allocation8 + $0x130] sm:$0xff]  ;;  %v797_v10 = vld [vmem:[#allocation8 + $0x128] sm:$0xff]  ;;  %v796_v11 = vld [vmem:[#allocation8 + $0x120] sm:$0xff]  ;;  %v3005_v19 = vsel %vm546_vm1, %v808_v15, %v809_v16  ;;  %v811_v20 = vrot.slane %v2961_v56, 4 }
  0xe8   : > { %1738 = vmatprep.subr.mxu0 %v2482_v0  ;;  %1779 = vmatprep.subr.mxu1 %v2482_v0  ;;  %v627_v63 = vsel %vm622_vm11, %v624_v53, %v626_v60  ;;  %v795_v12 = vld [vmem:[#allocation8 + $0x118] sm:$0xff]  ;;  %v794_v14 = vld [vmem:[#allocation8 + $0x110] sm:$0xff]  ;;  %v793_v17 = vld [vmem:[#allocation8 + $0x108] sm:$0xff] }
  0xe9   : > { %1739 = vmatpush3.msra.mxu0 %v610_v26  ;;  %1780 = vmatpush3.msra.mxu1 %v593_v27  ;;  %v792_v18 = vld [vmem:[#allocation8 + $0x100] sm:$0xff]  ;;  %v3013_v21 = vsel %vm546_vm1, %v809_v16, %v811_v20  ;;  %v950_v22 = vld [vmem:[#allocation10 + $0x78] sm:$0xff]  ;;  %v949_v23 = vld [vmem:[#allocation10 + $0x70] sm:$0xff] }
  0xea   : > { %1740 = vmatprep.subr.mxu0 %v2482_v0  ;;  %1781 = vmatprep.subr.mxu1 %v2482_v0  ;;  %v967_v24 = vld [vmem:[#allocation10 + $0xf8] sm:$0xff]  ;;  %v948_v26 = vld [vmem:[#allocation10 + $0x68] sm:$0xff]  ;;  %v966_v27 = vld [vmem:[#allocation10 + $0xf0] sm:$0xff] }
  0xeb   : > { %1741 = vmatpush3.msra.mxu0 %v609_v28  ;;  %1782 = vmatpush3.msra.mxu1 %v592_v31  ;;  %v965_v28 = vld [vmem:[#allocation10 + $0xe8] sm:$0xff]  ;;  %v947_v29 = vld [vmem:[#allocation10 + $0x60] sm:$0xff]  ;;  %v963_v31 = vld [vmem:[#allocation10 + $0xd8] sm:$0xff] }
  0xec   : > { %1742 = vmatprep.subr.mxu0 %v2482_v0  ;;  %1783 = vmatprep.subr.mxu1 %v2482_v0  ;;  %v964_v30 = vld [vmem:[#allocation10 + $0xe0] sm:$0xff]  ;;  %v945_v32 = vld [vmem:[#allocation10 + $0x50] sm:$0xff]  ;;  %v944_v34 = vld [vmem:[#allocation10 + $0x48] sm:$0xff] }
  0xed   : > { %1743 = vmatpush3.msra.mxu0 %v608_v35  ;;  %1784 = vmatpush3.msra.mxu1 %v591_v36  ;;  %v962_v33 = vld [vmem:[#allocation10 + $0xd0] sm:$0xff]  ;;  %v961_v35 = vld [vmem:[#allocation10 + $0xc8] sm:$0xff]  ;;  %v943_v36 = vld [vmem:[#allocation10 + $0x40] sm:$0xff] }
  0xee   : > { %1744 = vmatprep.subr.mxu0 %v2482_v0  ;;  %1785 = vmatprep.subr.mxu1 %v2482_v0  ;;  %v942_v37 = vld [vmem:[#allocation10 + $0x38] sm:$0xff]  ;;  %v960_v40 = vld [vmem:[#allocation10 + $0xc0] sm:$0xff]  ;;  %v957_v46 = vld [vmem:[#allocation10 + $0xa8] sm:$0xff] }
  0xef   : > { %1745 = vmatpush3.msra.mxu0 %v607_v42  ;;  %1786 = vmatpush3.msra.mxu1 %v590_v43  ;;  %v939_v41 = vld [vmem:[#allocation10 + $0x20] sm:$0xff]  ;;  %v959_v42 = vld [vmem:[#allocation10 + $0xb8] sm:$0xff]  ;;  %v936_v47 = vld [vmem:[#allocation10 + $0x8] sm:$0xff] }
  0xf0   : > { %1746 = vmatprep.subr.mxu0 %v2482_v0  ;;  %1787 = vmatprep.subr.mxu1 %v2482_v0  ;;  %v938_v43 = vld [vmem:[#allocation10 + $0x18] sm:$0xff]  ;;  %v935_v49 = vld [vmem:[#allocation10] sm:$0xff]  ;;  %v953_v52 = vld [vmem:[#allocation10 + $0x88] sm:$0xff] }
  0xf1   : > { %1747 = vmatpush3.msra.mxu0 %v606_v44  ;;  %1788 = vmatpush3.msra.mxu1 %v589_v45  ;;  %v958_v44 = vld [vmem:[#allocation10 + $0xb0] sm:$0xff]  ;;  %v952_v53 = vld [vmem:[#allocation10 + $0x80] sm:$0xff] }
  0xf2   : > { %1748 = vmatprep.subr.mxu0 %v2482_v0  ;;  %1789 = vmatprep.subr.mxu1 %v2482_v0  ;;  %v937_v45 = vld [vmem:[#allocation10 + $0x10] sm:$0xff] }
  0xf3   : > { %1749 = vmatpush3.msra.mxu0 %v605_v50  ;;  %1790 = vmatpush3.msra.mxu1 %v588_v51  ;;  %v955_v50 = vld [vmem:[#allocation10 + $0x98] sm:$0xff]  ;;  %v954_v51 = vld [vmem:[#allocation10 + $0x90] sm:$0xff] }
  0xf4   : > { %1750 = vmatprep.subr.mxu0 %v2482_v0  ;;  %1791 = vmatprep.subr.mxu1 %v2482_v0 }
  0xf5   : > { %1751 = vmatpush3.msra.mxu0 %v604_v54  ;;  %1792 = vmatpush3.msra.mxu1 %v587_v55  ;;  %v3018_v54 = vld [vmem:[#allocation10 + $0x178] sm:$0xff] }
  0xf6   : > { %1752 = vmatprep.subr.mxu0 %v2482_v0  ;;  %1793 = vmatprep.subr.mxu1 %v2482_v0  ;;  %v1255_v55 = vld [vmem:[#allocation11 + $0x78] sm:$0xff] }
  0xf7   : > { %1753 = vmatpush3.msra.mxu0 %v603_v57  ;;  %1794 = vmatpush3.msra.mxu1 %v586_v58 }
  0xf8   : > { %1755 = vmatmul.mubr.f32.vlgmr.msra.gmra.mxu0 %v625_v59  ;;  %1804 = vmatprep.subr.mxu0 %v2482_v0 }
  0xf9   : > { %1796 = vmatmul.mubr.msk.f32.vlgmr.msra.gmra.mxu1 %vm2922_vm6, %v556_v39  ;;  %1805 = vmatpush3.msra.mxu0 %v807_v61  ;;  %v940_v39 = vld [vmem:[#allocation10 + $0x28] sm:$0xff] }
  0xfa   : > { %1806 = vmatprep.subr.mxu0 %v2482_v0  ;;  %1757 = vmatprep.mubr.msk.f32.mxu0 %vm2483_vm0, %v2482_v0 }
  0xfb   : > { %1807 = vmatpush3.msra.mxu0 %v806_v62  ;;  %1798 = vmatprep.mubr.msk.f32.mxu1 %vm2483_vm0, %v2482_v0 }
  0xfc   : > { %1808 = vmatprep.subr.mxu0 %v2482_v0  ;;  %1758 = vmatmul.mubr.f32.gmra.mxu0 %v627_v63 }
  0xfd   : > { %1809 = vmatpush3.msra.mxu0 %v805_v1  ;;  %1799 = vmatmul.mubr.msk.f32.gmra.mxu1 %vm2931_vm7, %v2927_v38  ;;  %v941_v38 = vld [vmem:[#allocation10 + $0x30] sm:$0xff] }
  0xfe   : > { %1810 = vmatprep.subr.mxu0 %v2482_v0  ;;  %1760 = vmatprep.mubr.msk.f32.mxu0 %vm2483_vm0, %v2482_v0 }
  0xff   : > { %1811 = vmatpush3.msra.mxu0 %v804_v2  ;;  %1801 = vmatprep.mubr.msk.f32.mxu1 %vm2483_vm0, %v2482_v0 }
 0x100   : > { %1812 = vmatprep.subr.mxu0 %v2482_v0  ;;  %1761 = vmatmul.mubr.f32.gmra.mxu0 %v626_v60 }
 0x101   : > { %1813 = vmatpush3.msra.mxu0 %v803_v3  ;;  %1802 = vmatmul.mubr.msk.f32.gmra.mxu1 %vm2949_vm10, %v557_v48  ;;  %v956_v48 = vld [vmem:[#allocation10 + $0xa0] sm:$0xff] }
 0x102   : > { %1814 = vmatprep.subr.mxu0 %v2482_v0  ;;  %1836 = vmatprep.mubr.msk.f32.mxu0 %vm2483_vm0, %v2482_v0 }
 0x103   : > { %1815 = vmatpush3.msra.mxu0 %v802_v4  ;;  %1845 = vmatprep.subr.mxu1 %v967_v24 }
 0x104   : > { %1816 = vmatprep.subr.mxu0 %v2482_v0  ;;  %1846 = vmatpush3.msra.mxu1 %v967_v24 }
 0x105   : > { %1817 = vmatpush3.msra.mxu0 %v801_v5  ;;  %1847 = vmatprep.subr.mxu1 %v966_v27  ;;  %v913_v5 = vstv %s1573_s6 }
 0x106   : > { %1818 = vmatprep.subr.mxu0 %v2482_v0  ;;  %1848 = vmatpush3.msra.mxu1 %v966_v27 }
 0x107   : > { %1819 = vmatpush3.msra.mxu0 %v800_v6  ;;  %1849 = vmatprep.subr.mxu1 %v965_v28  ;;  %v914_v6 = vadd.s32 %v913_v5, %v2884_v8 }
 0x108   : > { %1820 = vmatprep.subr.mxu0 %v2482_v0  ;;  %1850 = vmatpush3.msra.mxu1 %v965_v28 }
 0x109   : > { %1821 = vmatpush3.msra.mxu0 %v799_v7  ;;  %1851 = vmatprep.subr.mxu1 %v964_v30  ;;  %vm917_vm12 = vcmp.ge.s32.totalorder %v914_v6, 0  ;;  %vm920_vm13 = vcmp.lt.s32.totalorder %v914_v6, 24  ;;  %v1129_v6 = vld [vmem:[#allocation10 + $0x100] sm:$0xff] }
 0x10a   : > { %1822 = vmatprep.subr.mxu0 %v2482_v0  ;;  %1852 = vmatpush3.msra.mxu1 %v964_v30  ;;  %vm923_vm14 = vmand %vm917_vm12, %vm920_vm13  ;;  %v1254_v30 = vld [vmem:[#allocation11 + $0x70] sm:$0xff] }
 0x10b   : > { %1823 = vmatpush3.msra.mxu0 %v798_v9  ;;  %1853 = vmatprep.subr.mxu1 %v963_v31 }
 0x10c   : > { %1824 = vmatprep.subr.mxu0 %v2482_v0  ;;  %1854 = vmatpush3.msra.mxu1 %v963_v31 }
 0x10d   : > { %1825 = vmatpush3.msra.mxu0 %v797_v10  ;;  %1855 = vmatprep.subr.mxu1 %v962_v33  ;;  %v1572_v10 = vld [vmem:[%s3241_s24] ss:$0 sm:$0xff] }
 0x10e   : > { %1826 = vmatprep.subr.mxu0 %v2482_v0  ;;  %1856 = vmatpush3.msra.mxu1 %v962_v33  ;;  %v1253_v33 = vld [vmem:[#allocation11 + $0x68] sm:$0xff] }
 0x10f   : > { %1827 = vmatpush3.msra.mxu0 %v796_v11  ;;  %1857 = vmatprep.subr.mxu1 %v961_v35 }
 0x110   : > { %1828 = vmatprep.subr.mxu0 %v2482_v0  ;;  %1858 = vmatpush3.msra.mxu1 %v961_v35 }
 0x111   : > { %1829 = vmatpush3.msra.mxu0 %v795_v12  ;;  %1859 = vmatprep.subr.mxu1 %v960_v40  ;;  %v915_v12 = vadd.s32 %v913_v5, %v2893_v13 }
 0x112   : > { %1830 = vmatprep.subr.mxu0 %v2482_v0  ;;  %1860 = vmatpush3.msra.mxu1 %v960_v40  ;;  %v1251_v40 = vld [vmem:[#allocation11 + $0x58] sm:$0xff] }
 0x113   : > { %1831 = vmatpush3.msra.mxu0 %v794_v14  ;;  %1861 = vmatprep.subr.mxu1 %v959_v42  ;;  %vm918_vm15 = vcmp.ge.s32.totalorder %v915_v12, 0 }
 0x114   : > { %1832 = vmatprep.subr.mxu0 %v2482_v0  ;;  %1862 = vmatpush3.msra.mxu1 %v959_v42  ;;  %v1143_v42 = vld [vmem:[#allocation10 + $0x170] sm:$0xff] }
 0x115   : > { %1833 = vmatpush3.msra.mxu0 %v793_v17  ;;  %1863 = vmatprep.subr.mxu1 %v958_v44 }
 0x116   : > { %1834 = vmatprep.subr.mxu0 %v2482_v0  ;;  %1864 = vmatpush3.msra.mxu1 %v958_v44  ;;  %v1250_v44 = vld [vmem:[#allocation11 + $0x50] sm:$0xff] }
 0x117   : > { %1835 = vmatpush3.msra.mxu0 %v792_v18  ;;  %1865 = vmatprep.subr.mxu1 %v957_v46  ;;  %v916_v18 = vadd.s32 %v913_v5, %v2908_v25 }
 0x118   : > { %1837 = vmatmul.mubr.f32.vlgmr.msra.gmra.mxu0 %v3005_v19  ;;  %1880 = vmatprep.subr.mxu0 %v950_v22 }
 0x119   : > { %1839 = vmatprep.mubr.msk.f32.mxu0 %vm2483_vm0, %v2482_v0  ;;  %1881 = vmatpush3.msra.mxu0 %v950_v22  ;;  %vm919_vm3 = vcmp.ge.s32.totalorder %v916_v18, 0  ;;  %vm922_vm4 = vcmp.lt.s32.totalorder %v916_v18, 24 }
 0x11a   : > { %1882 = vmatprep.subr.mxu0 %v949_v23  ;;  %1866 = vmatpush3.msra.mxu1 %v957_v46  ;;  %vm925_vm5 = vmand %vm919_vm3, %vm922_vm4  ;;  %v1249_v46 = vld [vmem:[#allocation11 + $0x48] sm:$0xff] }
 0x11b   : > { %1883 = vmatpush3.msra.mxu0 %v949_v23  ;;  %1867 = vmatprep.subr.mxu1 %v956_v48 }
 0x11c   : > { %1840 = vmatmul.mubr.f32.gmra.mxu0 %v3013_v21  ;;  %1884 = vmatprep.subr.mxu0 %v948_v26 }
 0x11d   : > { %1842 = vmatprep.mubr.msk.f32.mxu0 %vm2483_vm0, %v2482_v0  ;;  %1885 = vmatpush3.msra.mxu0 %v948_v26  ;;  %v946_v0 = vld [vmem:[#allocation10 + $0x58] sm:$0xff]  ;;  %vm921_vm0 = vcmp.lt.s32.totalorder %v915_v12, 24 }
 0x11e   : > { %1886 = vmatprep.subr.mxu0 %v947_v29  ;;  %1868 = vmatpush3.msra.mxu1 %v956_v48  ;;  %vm924_vm2 = vmand %vm918_vm15, %vm921_vm0  ;;  %v1248_v48 = vld [vmem:[#allocation11 + $0x40] sm:$0xff] }
 0x11f   : > { %1887 = vmatpush3.msra.mxu0 %v947_v29  ;;  %1869 = vmatprep.subr.mxu1 %v955_v50 }
 0x120   : > { %1843 = vmatmul.mubr.f32.gmra.mxu0 %v811_v20  ;;  %1888 = vmatprep.subr.mxu0 %v946_v0 }
 0x121   : > { %1889 = vmatpush3.msra.mxu0 %v946_v0  ;;  %1870 = vmatpush3.msra.mxu1 %v955_v50  ;;  %v1247_v50 = vld [vmem:[#allocation11 + $0x38] sm:$0xff] }
 0x122   : > { %1890 = vmatprep.subr.mxu0 %v945_v32  ;;  %1871 = vmatprep.subr.mxu1 %v954_v51 }
 0x123   : > { %1891 = vmatpush3.msra.mxu0 %v945_v32  ;;  %1872 = vmatpush3.msra.mxu1 %v954_v51  ;;  %v1139_v51 = vld [vmem:[#allocation10 + $0x150] sm:$0xff] }
 0x124   : > { %1892 = vmatprep.subr.mxu0 %v944_v34  ;;  %1873 = vmatprep.subr.mxu1 %v953_v52 }
 0x125   : > { %1893 = vmatpush3.msra.mxu0 %v944_v34  ;;  %1874 = vmatpush3.msra.mxu1 %v953_v52  ;;  %v1246_v52 = vld [vmem:[#allocation11 + $0x30] sm:$0xff] }
 0x126   : > { %1894 = vmatprep.subr.mxu0 %v943_v36  ;;  %1875 = vmatprep.subr.mxu1 %v952_v53 }
 0x127   : > { %1895 = vmatpush3.msra.mxu0 %v943_v36  ;;  %1876 = vmatpush3.msra.mxu1 %v952_v53  ;;  %v1252_v36 = vld [vmem:[#allocation11 + $0x60] sm:$0xff]  ;;  %v1138_v53 = vld [vmem:[#allocation10 + $0x148] sm:$0xff] }
 0x128   : > { %1896 = vmatprep.subr.mxu0 %v942_v37  ;;  %1915 = vmatprep.subr.mxu1 %v3018_v54 }
 0x129   : > { %1897 = vmatpush3.msra.mxu0 %v942_v37 }
 0x12a   : > { %1898 = vmatprep.subr.mxu0 %v941_v38 }
 0x12b   : > { %1899 = vmatpush3.msra.mxu0 %v941_v38 }
 0x12c   : > { %1900 = vmatprep.subr.mxu0 %v940_v39 }
 0x12d   : > { %1901 = vmatpush3.msra.mxu0 %v940_v39 }
 0x12e   : > { %1902 = vmatprep.subr.mxu0 %v939_v41 }
 0x12f   : > { %1903 = vmatpush3.msra.mxu0 %v939_v41 }
 0x130   : > { %1904 = vmatprep.subr.mxu0 %v938_v43 }
 0x131   : > { %1905 = vmatpush3.msra.mxu0 %v938_v43 }
 0x132   : > { %1906 = vmatprep.subr.mxu0 %v937_v45 }
 0x133   : > { %1907 = vmatpush3.msra.mxu0 %v937_v45  ;;  %v1142_v45 = vld [vmem:[#allocation10 + $0x168] sm:$0xff] }
 0x134   : > { %1908 = vmatprep.subr.mxu0 %v936_v47 }
 0x135   : > { %1909 = vmatpush3.msra.mxu0 %v936_v47  ;;  %v1141_v47 = vld [vmem:[#allocation10 + $0x160] sm:$0xff] }
 0x136   : > { %1910 = vmatprep.subr.mxu0 %v935_v49 }
 0x137   : > { %1911 = vmatpush3.msra.mxu0 %v935_v49  ;;  %v1140_v49 = vld [vmem:[#allocation10 + $0x158] sm:$0xff] }
 0x138   : > { %1950 = vmatprep.subr.mxu0 %v1255_v55 }
 0x1b8   : > { %v697_v56 = vpop.f32.mrf.mxu0 }
 0x1b9   : > { %v777_v57 = vpop.f32.mrf.mxu1 }
 0x1ba   : > { %v1756_v58 = vpop.f32.mrf.mxu0  ;;  %v778_v7 = vadd.f32 %v777_v57, %v697_v56  ;;  %v1244_v56 = vld [vmem:[#allocation11 + $0x20] sm:$0xff]  ;;  %v1136_v57 = vld [vmem:[#allocation10 + $0x138] sm:$0xff] }
 0x1bb   : > { %v1797_v59 = vpop.f32.mrf.mxu1  ;;  %v1243_v58 = vld [vmem:[#allocation11 + $0x18] sm:$0xff] }
 0x1bc   : > { %v702_v60 = vpop.f32.mrf.mxu0  ;;  %v1135_v59 = vld [vmem:[#allocation10 + $0x130] sm:$0xff] }
 0x1bd   : > { %v782_v61 = vpop.f32.mrf.mxu1 }
 0x1be   : > { %v1759_v62 = vpop.f32.mrf.mxu0  ;;  %v783_v15 = vadd.f32 %v782_v61, %v702_v60  ;;  %v1242_v60 = vld [vmem:[#allocation11 + $0x10] sm:$0xff]  ;;  %v1134_v61 = vld [vmem:[#allocation10 + $0x128] sm:$0xff] }
 0x1bf   : > { %v1800_v63 = vpop.f32.mrf.mxu1  ;;  %v1241_v62 = vld [vmem:[#allocation11 + $0x8] sm:$0xff] }
 0x1c0   : > { %v707_v1 = vpop.f32.mrf.mxu0  ;;  %v1133_v63 = vld [vmem:[#allocation10 + $0x120] sm:$0xff] }
 0x1c1   : > { %v787_v2 = vpop.f32.mrf.mxu1 }
 0x1c2   : > { %v1762_v3 = vpop.f32.mrf.mxu0  ;;  %v788_v23 = vadd.f32 %v787_v2, %v707_v1  ;;  %v1240_v1 = vld [vmem:[#allocation11] sm:$0xff]  ;;  %v1132_v2 = vld [vmem:[#allocation10 + $0x118] sm:$0xff] }
 0x1c3   : > { %v1803_v4 = vpop.f32.mrf.mxu1  ;;  %v1131_v3 = vld [vmem:[#allocation10 + $0x110] sm:$0xff] }
 0x1c4   : > { %v1130_v4 = vld [vmem:[#allocation10 + $0x108] sm:$0xff] }
 0x1d8   : > { %v882_v9 = vpop.f32.mrf.mxu0 }
 0x1d9   : > { %v896_v11 = vadd.f32 %v882_v9, %v778_v7 }
 0x1da   : > { %v1838_v14 = vpop.f32.mrf.mxu0 }
 0x1db   : > { %v906_v16 = vadd.f32 %v1572_v10, %v896_v11 }
 0x1dc   : > { %v887_v17 = vpop.f32.mrf.mxu0 }
 0x1dd   : > { %v909_v20 = vmax.f32 %v906_v16, 0.0  ;;  %v897_v8 = vadd.f32 %v887_v17, %v783_v15  ;;  %v1576_v15 = vld [vmem:[%s3242_s12] ss:$0 sm:$0xff] }
 0x1de   : > { %v1841_v22 = vpop.f32.mrf.mxu0  ;;  %v1577_v17 = vld [vmem:[%s3243_s27] ss:$0 sm:$0xff] }
 0x1df   : > { %v907_v24 = vadd.f32 %v1572_v10, %v897_v8  ;;  %1912 = vmatprep.mubr.msk.f32.mxu0 %vm923_vm14, %v909_v20  ;;  %v932_v27 = vsel %vm923_vm14, %v909_v20, 0.0 }
 0x1e0   : > { %v892_v26 = vpop.f32.mrf.mxu0  ;;  %v971_v32 = vrot.slane %v932_v27, 2  ;;  %v1145_v41 = vrot.slane %v932_v27, 4 }
 0x1e1   : > { %v910_v13 = vmax.f32 %v907_v24, 0.0  ;;  %v898_v28 = vadd.f32 %v892_v26, %v788_v23 }
 0x1e2   : > { %v1844_v29 = vpop.f32.mrf.mxu0 }
 0x1e3   : > { %v3029_v0 = vsel %vm924_vm2, %v910_v13, 0.0  ;;  %v908_v25 = vadd.f32 %v1572_v10, %v898_v28  ;;  %1913 = vmatmul.mubr.msk.f32.vlgmr.msra.gmra.mxu0 %vm924_vm2, %v910_v13 }
 0x1e4   : > { %v972_v31 = vrot.slane %v3029_v0, 2  ;;  %1951 = vmatpush3.msra.mxu0 %v1255_v55  ;;  %1982 = vmatprep.mubr.f32.mxu0 %v3005_v19  ;;  %v1146_v37 = vrot.slane %v3029_v0, 4  ;;  %v1137_v55 = vld [vmem:[#allocation10 + $0x140] sm:$0xff] }
 0x1e5   : > { %v911_v34 = vmax.f32 %v908_v25, 0.0  ;;  %1952 = vmatprep.subr.mxu0 %v1254_v30 }
 0x1e6   : > { %v973_v35 = vsel %vm622_vm11, %v971_v32, %v972_v31  ;;  %1953 = vmatpush3.msra.mxu0 %v1254_v30  ;;  %v1147_v43 = vsel %vm546_vm1, %v1145_v41, %v1146_v37 }
 0x1e7   : > { %v3035_v38 = vsel %vm925_vm5, %v911_v34, 0.0  ;;  %1877 = vmatprep.mubr.f32.mxu1 %v973_v35  ;;  %1954 = vmatprep.subr.mxu0 %v1253_v33 }
 0x1e8   : > { %v974_v39 = vrot.slane %v3035_v38, 2  ;;  %1955 = vmatpush3.msra.mxu0 %v1253_v33  ;;  %v1148_v5 = vrot.slane %v3035_v38, 4 }
 0x1e9   : > { %1956 = vmatprep.subr.mxu0 %v1252_v36 }
 0x1ea   : > { %v975_v19 = vsel %vm622_vm11, %v972_v31, %v974_v39  ;;  %1957 = vmatpush3.msra.mxu0 %v1252_v36  ;;  %v1149_v7 = vsel %vm546_vm1, %v1146_v37, %v1148_v5 }
 0x1eb   : > { %1878 = vmatmul.mubr.f32.vlgmr.msra.gmra.mxu1 %v975_v19  ;;  %1958 = vmatprep.subr.mxu0 %v1251_v40 }
 0x1ec   : > { %1916 = vmatpush3.msra.mxu1 %v3018_v54  ;;  %1947 = vmatprep.mubr.f32.mxu1 %v1147_v43  ;;  %v1245_v54 = vld [vmem:[#allocation11 + $0x28] sm:$0xff] }
 0x1ed   : > { %1917 = vmatprep.subr.mxu1 %v1143_v42  ;;  %1959 = vmatpush3.msra.mxu0 %v1251_v40 }
 0x1ee   : > { %1918 = vmatpush3.msra.mxu1 %v1143_v42  ;;  %1960 = vmatprep.subr.mxu0 %v1250_v44 }
 0x1ef   : > { %1919 = vmatprep.subr.mxu1 %v1142_v45  ;;  %1961 = vmatpush3.msra.mxu0 %v1250_v44 }
 0x1f0   : > { %1920 = vmatpush3.msra.mxu1 %v1142_v45  ;;  %1962 = vmatprep.subr.mxu0 %v1249_v46 }
 0x1f1   : > { %1921 = vmatprep.subr.mxu1 %v1141_v47  ;;  %1963 = vmatpush3.msra.mxu0 %v1249_v46 }
 0x1f2   : > { %1922 = vmatpush3.msra.mxu1 %v1141_v47  ;;  %1964 = vmatprep.subr.mxu0 %v1248_v48 }
 0x1f3   : > { %1923 = vmatprep.subr.mxu1 %v1140_v49  ;;  %1965 = vmatpush3.msra.mxu0 %v1248_v48 }
 0x1f4   : > { %1924 = vmatpush3.msra.mxu1 %v1140_v49  ;;  %1966 = vmatprep.subr.mxu0 %v1247_v50 }
 0x1f5   : > { %1925 = vmatprep.subr.mxu1 %v1139_v51  ;;  %1967 = vmatpush3.msra.mxu0 %v1247_v50 }
 0x1f6   : > { %1926 = vmatpush3.msra.mxu1 %v1139_v51  ;;  %1968 = vmatprep.subr.mxu0 %v1246_v52 }
 0x1f7   : > { %1927 = vmatprep.subr.mxu1 %v1138_v53  ;;  %1969 = vmatpush3.msra.mxu0 %v1246_v52 }
 0x1f8   : > { %1928 = vmatpush3.msra.mxu1 %v1138_v53  ;;  %1970 = vmatprep.subr.mxu0 %v1245_v54 }
 0x1f9   : > { %1929 = vmatprep.subr.mxu1 %v1137_v55  ;;  %1971 = vmatpush3.msra.mxu0 %v1245_v54 }
 0x1fa   : > { %1930 = vmatpush3.msra.mxu1 %v1137_v55  ;;  %1972 = vmatprep.subr.mxu0 %v1244_v56 }
 0x1fb   : > { %1931 = vmatprep.subr.mxu1 %v1136_v57  ;;  %1973 = vmatpush3.msra.mxu0 %v1244_v56 }
 0x1fc   : > { %1932 = vmatpush3.msra.mxu1 %v1136_v57  ;;  %1974 = vmatprep.subr.mxu0 %v1243_v58 }
 0x1fd   : > { %1933 = vmatprep.subr.mxu1 %v1135_v59  ;;  %1975 = vmatpush3.msra.mxu0 %v1243_v58 }
 0x1fe   : > { %1934 = vmatpush3.msra.mxu1 %v1135_v59  ;;  %1976 = vmatprep.subr.mxu0 %v1242_v60 }
 0x1ff   : > { %1935 = vmatprep.subr.mxu1 %v1134_v61  ;;  %1977 = vmatpush3.msra.mxu0 %v1242_v60 }
 0x200   : > { %1936 = vmatpush3.msra.mxu1 %v1134_v61  ;;  %1978 = vmatprep.subr.mxu0 %v1241_v62 }
 0x201   : > { %1937 = vmatprep.subr.mxu1 %v1133_v63  ;;  %1979 = vmatpush3.msra.mxu0 %v1241_v62 }
 0x202   : > { %1938 = vmatpush3.msra.mxu1 %v1133_v63  ;;  %1980 = vmatprep.subr.mxu0 %v1240_v1 }
 0x203   : > { %1939 = vmatprep.subr.mxu1 %v1132_v2  ;;  %1981 = vmatpush3.msra.mxu0 %v1240_v1 }
 0x204   : > { %1940 = vmatpush3.msra.mxu1 %v1132_v2  ;;  %1983 = vmatmul.mubr.f32.vlgmr.msra.gmra.mxu0 %v3013_v21 }
 0x205   : > { %1941 = vmatprep.subr.mxu1 %v1131_v3 }
 0x206   : > { %1942 = vmatpush3.msra.mxu1 %v1131_v3 }
 0x207   : > { %1943 = vmatprep.subr.mxu1 %v1130_v4 }
 0x208   : > { %1944 = vmatpush3.msra.mxu1 %v1130_v4 }
 0x209   : > { %1945 = vmatprep.subr.mxu1 %v1129_v6 }
 0x20a   : > { %1946 = vmatpush3.msra.mxu1 %v1129_v6 }
 0x20b   : > { %1948 = vmatmul.mubr.f32.vlgmr.msra.gmra.mxu1 %v1149_v7 }
 0x2a3   : > { %v1914_v9 = vpop.f32.mrf.mxu0 }
 0x2a5   : > { %v1119_v11 = vpop.f32.mrf.mxu0 }
 0x2ab   : > { %v1879_v10 = vpop.f32.mrf.mxu1 }
 0x2ac   : > { %v1125_v14 = vadd.f32 %v1914_v9, %v1879_v10 }
 0x2ad   : > { %v1044_v12 = vpop.f32.mrf.mxu1 }
 0x2ae   : > { %v1120_v18 = vadd.f32 %v1119_v11, %v1044_v12 }
 0x2c4   : > { %v1984_v16 = vpop.f32.mrf.mxu0 }
 0x2c5   : > { %v1335_v24 = vadd.f32 %v1984_v16, %v1577_v17 }
 0x2c6   : > { %v1329_v26 = vpop.f32.mrf.mxu0 }
 0x2c7   : > { %v1330_v30 = vadd.f32 %v1577_v17, %v1329_v26 }
 0x2cb   : > { %v1949_v21 = vpop.f32.mrf.mxu1 }
 0x2cc   : > { %v1228_v20 = vadd.f32 %v1949_v21, %v1125_v14 }
 0x2cd   : > { %v1218_v8 = vpop.f32.mrf.mxu1 }
 0x2ce   : > { %v1237_v22 = vadd.f32 %v1576_v15, %v1228_v20  ;;  %v1227_v23 = vadd.f32 %v1218_v8, %v1120_v18 }
 0x2d0   : > { %v1239_v13 = vmax.f32 %v1237_v22, 0.0  ;;  %v1236_v27 = vadd.f32 %v1576_v15, %v1227_v23 }
 0x2d2   : > { %v1238_v28 = vmax.f32 %v1236_v27, 0.0  ;;  %v1339_v29 = vadd.f32 %v1335_v24, %v1239_v13 }
 0x2d4   : > { %v1341_v0 = vmax.f32 %v1339_v29, 0.0  ;;  %v1338_v25 = vadd.f32 %v1330_v30, %v1238_v28  ;;  %1351 = sbr.rel (!%p2698_p13) target bundleno = 756 (0x2f4), region = 84 }
 0x2d6   : > { %1343 = vst [vmem:[%s521_s18 + $0x8] sm:$0xff] %v1341_v0  ;;  %v1340_v31 = vmax.f32 %v1338_v25, 0.0 }
 0x2d8   : > { %1342 = vst [vmem:[%s521_s18] sm:$0xff] %v1340_v31 }
 0x2d9   : > { %s3282_s8 = smov (!%p1354_p11, %s1353_s8), 2 }
 0x2da   : > { %s3062_s10 = sshll.u32 %s3282_s8, 7 }
 0x2db   : > { %s1358_s20 = ssub.s32 256, %s3062_s10 }
 0x2dc   : > { %1359 = vsyncadd %s3057_s5, %s1358_s20  ;;  %s3246_s25 = sld [smem:[#allocation24_spill]]  ;;  %p1581_p7 = scmp.ne.s32.totalorder %s3062_s10, 0 }
 0x2dd   : > { %s1366_s19 = sshll.u32 %s521_s18, 4  ;;  %s3247_s24 = sld [smem:[#allocation42_spill]]  ;;  %s3068_s19 = int_to_ptr.vmem [resolvable:$true] %s1366_s19 }
 0x2de   : > { %s2307_s30 = scalar_lea.vmem %s3068_s19, %s3062_s10  ;;  %s2484_s12 = smov [#allocation13]  }
 0x2df   : > { %p2308_p13 = scmp.ne.s32.totalorder %s3068_s19, %s2307_s30  ;;  %s2311_s9 = sshll.u32 %s2484_s12, 4  ;;  %s2312_s9 = int_to_ptr.vmem [resolvable:$false] %s2311_s9 }
 0x2e0   : > { %s2313_s13 = scalar_lea.vmem %s2312_s9, 512  ;;  %p2314_p5 = scmp.lt.s32.totalorder %s3068_s19, %s2312_s9 }
 0x2e1   : > { %p2309_p2 = pnand %p2308_p13, %p1581_p7  ;;  %p2315_p6 = scmp.lt.s32.totalorder %s2313_s13, %s2307_s30 }
 0x2e2   : > { %s1988_s15 = smul.u32 3, %s3246_s25 }
 0x2e3   : > { %p2310_p12 = pneg %p2309_p2  ;;  %p2316_p10 = por %p2315_p6, %p2314_p5 }
 0x2e4   : > { %s1362_s28 = sadd.s32 %s1988_s15, %s1579_s29 }
 0x2e5   : > { %s1582_s6 = sshll.u32 %s1362_s28, 7  ;;  %p2317_p1 = pnand %p2316_p10, %p2310_p12 }
 0x2e6   : > { %s3073_s26 = scalar_lea.hbm %s3247_s24, %s1582_s6 }
 0x2e7   : > { %2320 = shalt.err (!%p2317_p1)
}
 0x2e8   : > { %s2321_s27 = scalar_lea.hbm %s3073_s26, %s3062_s10  ;;  %s2325_s23 = scalar_lea.hbm %s3247_s24, 768 }
 0x2e9   : > { %p2322_p0 = scmp.ne.s32.totalorder %s3073_s26, %s2321_s27  ;;  %p2326_p9 = scmp.lt.s32.totalorder %s3073_s26, %s3247_s24 }
 0x2ea   : > { %p2327_p8 = scmp.lt.s32.totalorder %s2325_s23, %s2321_s27 }
 0x2eb   : > { %p2323_p3 = pnand %p2322_p0, %p1581_p7 }
 0x2ec   : > { %p2328_p11 = por %p2327_p8, %p2326_p9 }
 0x2ed   : > { %p2324_p4 = pneg %p2323_p3 }
 0x2ef   : > { %p2329_p13 = pnand %p2328_p11, %p2324_p4 }
 0x2f1   : > { %2332 = shalt.err (!%p2329_p13)
}
 0x2f2   : > { %s2485_s20 = smov 128   ;;  %s2486_s25 = smov 8  }
 0x2f3   : > { %1372 = dma.vmem_to_hbm [thread:$0]  (%p1581_p7), %s3068_s19, %s3062_s10, %s3073_s26, %s3057_s5, %s2485_s20, %s2485_s20, %s2486_s25  }
 0x2f4 PF: > { %s3248_s15 = sld [smem:[#allocation21_spill]]  ;;  %p2027_p2 = scmp.ge.s32.totalorder %s2470_s22, 2 }
 0x2f5   : > { %s3249_s28 = sld [smem:[#allocation35_spill]] }
 0x2fa   : > { %s1381_s6 = sand.u32 1, %s3248_s15  }
 0x2fb   : > { %p3250_p12 = scmp.ne.s32.totalorder %s3249_s28, 0  ;;  %s1382_s7 = scalar_lea.sflag [#allocation4], %s1381_s6 }
 0x2fd   : > { %p2018_p5 = pnand %p2027_p2, %p3250_p12 }
 0x2ff   : > { %p2019_p6 = pneg %p2018_p5 }
 0x301   : > { %2410 = dma.done.wait (%p2019_p6), %s1382_s7, 256  }
 0x302   : > { %2412 = vsyncadd (%p2019_p6), %s1382_s7, 4294967040  ;;  %s30_s22 = sadd.s32 1, %s2470_s22   ;;  %s3252_s30 = sld [smem:[#allocation20_spill]] }
 0x303   : > { %p3104_p10 = scmp.ge.s32.totalorder %s30_s22, 6   ;;  %s3253_s5 = sld [smem:[#allocation34_spill]] }
 0x304   : > { %s3254_s12 = sld [smem:[#allocation22_spill]]  ;;  %s3260_s10 = smov %s2426_s11 }
 0x305   : > { %s3255_s19 = sld [smem:[#allocation30_spill]]  ;;  %s3262_s13 = smov %s2438_s14 }
 0x306   : > { %s3256_s26 = sld [smem:[#allocation29_spill]]  ;;  %s3264_s15 = smov %s2446_s16 }
 0x307   : > { %s3257_s18 = sld [smem:[#allocation25_spill]]  ;;  %s3265_s16 = smov %s2450_s17 }
 0x308   : > { %s3258_s20 = sld [smem:[#allocation27_spill]] }
 0x309   : > { %s3259_s9 = sld [smem:[#allocation28_spill]]  ;;  %s3261_s11 = smov %s3253_s5 }
 0x30b   : > { %s3263_s14 = smov %s3255_s19  ;;  %s3267_s19 = smov %s2466_s21 }
 0x30c   : > { %s3266_s17 = smov %s3256_s26  ;;  %29 = sbr.rel (!%p3104_p10) target bundleno = 22 (0x16), region = 141 }
 0x30f   : > { %s3268_s21 = smov %s3259_s9 }
 0x311   :  { %1387 = vsyncpa [#allocation3], 1 }
 0x312   :  { %1389 = vsyncpa [#allocation3 + $0x1], 1 }
 0x313   :  { %1390 = vsyncpa [#allocation6], 1 }
 0x314   :  { %1392 = vsyncpa [#allocation6 + $0x1], 1 }
 0x315   :  { %1393 = vsyncpa [#allocation9], 1 }
 0x316   :  { %1394 = vsyncpa [#allocation12], 1 }
 0x317   :  { %1395 = vsyncpa [#allocation4], 1 }
 0x318   :  { %1397 = vsyncpa [#allocation4 + $0x1], 1 }

</bundles_post_ra>
